<compile_context>
chip_gen: v7x
topology: tpu7x:2x2x1
jax: 0.10.0
libtpu: 0.0.40
codegen_flags: <defaults>
</compile_context>

<pallas_src>
import functools

import jax
import jax.numpy as jnp
from jax.experimental import pallas as pl
from jax.experimental.pallas import tpu as pltpu


def _round_up(x, m):
    return ((x + m - 1) // m) * m


def _cpad(c):
    return _round_up(c, 128)


@functools.lru_cache(maxsize=None)
def _vmem_limit_bytes():
    # v5e/v6e have 128 MiB physical VMEM; v7x only 64 MiB -> stay at 32 MiB there.
    try:
        kind = jax.devices()[0].device_kind.lower()
    except Exception:
        return 32 * 1024 * 1024
    for tag in ("v5 lite", "v5e", "v5lite", "v6 lite", "v6e", "v6lite"):
        if tag in kind:
            return 64 * 1024 * 1024
    return 32 * 1024 * 1024


def _compiler_params(semantics):
    return pltpu.CompilerParams(dimension_semantics=semantics,
                                vmem_limit_bytes=_vmem_limit_bytes())


def _choose_m_tile(m):
    """Return (padded M, tile M)."""
    for tm in (1024, 512, 256, 128):
        if m % tm == 0:
            return m, tm
    if m <= 1024:
        mp = _round_up(m, 16)           # 16: bf16 sublane packing
        return mp, mp
    mp = _round_up(m, 256)
    return mp, 256


def _ensure_two_parallel_tiles(mp, tm, n, tn):
    """Make the parallel output grid >= 2 tiles (v7x has 2 TensorCores)."""
    if (mp // tm) * (n // tn) >= 2:
        return tm, tn
    half = n // 2
    if half >= 128 and half % 128 == 0:
        return tm, half
    if n > 128 and n % 128 == 0:
        return tm, 128
    if tm >= 32 and tm % 16 == 0:
        return tm // 2, tn
    return tm, tn


# ----------------------------- GEMM (1x1 convs / im2col) --------------------

def _gemm_kernel(a_ref, b_ref, bias_ref, o_ref, *, relu):
    acc = jnp.dot(a_ref[...], b_ref[...], preferred_element_type=jnp.float32)
    out = acc + bias_ref[...]
    if relu:
        out = jnp.maximum(out, 0.0)
    o_ref[...] = out.astype(o_ref.dtype)


def _gemm_res_kernel(a_ref, b_ref, bias_ref, r_ref, o_ref, *, relu):
    acc = jnp.dot(a_ref[...], b_ref[...], preferred_element_type=jnp.float32)
    out = acc + bias_ref[...] + r_ref[...].astype(jnp.float32)
    if relu:
        out = jnp.maximum(out, 0.0)
    o_ref[...] = out.astype(o_ref.dtype)


def gemm_bias(a, w, bias, *, relu, residual=None, out_dtype=jnp.bfloat16):
    """out = maybe_relu(a @ w + bias [+ residual]).  Single K step (TK = K)."""
    M, K = a.shape
    K2, N = w.shape
    assert K == K2, (K, K2)

    a = a.astype(jnp.bfloat16)
    Mp, TM = _choose_m_tile(M)
    if Mp != M:
        a = jnp.pad(a, ((0, Mp - M), (0, 0)))
    TN = N
    TM, TN = _ensure_two_parallel_tiles(Mp, TM, N, TN)

    bias2d = bias.reshape(1, N).astype(jnp.float32)
    grid = (Mp // TM, N // TN)

    in_specs = [
        pl.BlockSpec((TM, K), lambda i, j: (i, 0)),
        pl.BlockSpec((K, TN), lambda i, j: (0, j)),
        pl.BlockSpec((1, TN), lambda i, j: (0, j)),
    ]
    args = [a, w, bias2d]
    if residual is not None:
        r = residual.astype(jnp.bfloat16)
        if Mp != M:
            r = jnp.pad(r, ((0, Mp - M), (0, 0)))
        in_specs.append(pl.BlockSpec((TM, TN), lambda i, j: (i, j)))
        args.append(r)
        kernel = functools.partial(_gemm_res_kernel, relu=relu)
    else:
        kernel = functools.partial(_gemm_kernel, relu=relu)

    out = pl.pallas_call(
        kernel,
        out_shape=jax.ShapeDtypeStruct((Mp, N), out_dtype),
        grid_spec=pltpu.PrefetchScalarGridSpec(
            num_scalar_prefetch=0,
            grid=grid,
            in_specs=in_specs,
            out_specs=pl.BlockSpec((TM, TN), lambda i, j: (i, j)),
        ),
        compiler_params=_compiler_params(("parallel", "parallel")),
    )(*args)
    if Mp != M:
        out = out[:M]
    return out


# --------------------- 3x3 stride-1 conv without HBM im2col -----------------

def _conv3x3_kernel(x_ref, w_ref, b_ref, o_ref, *, m_wide, wp2, relu):
    # x_ref: (1, (H+3)*(W+2), C) flattened padded input for one batch element.
    # Each tap (kh, kw) is the same matrix shifted by kh*(W+2)+kw rows.
    xv = x_ref[0, :, :]
    acc = None
    for kh in range(3):
        for kw in range(3):
            off = kh * wp2 + kw
            a = xv[off:off + m_wide, :]
            p = jnp.dot(a, w_ref[kh * 3 + kw, :, :],
                        preferred_element_type=jnp.float32)
            acc = p if acc is None else acc + p
    out = acc + b_ref[...]
    if relu:
        out = jnp.maximum(out, 0.0)
    o_ref[0, :, :] = out.astype(o_ref.dtype)


def conv3x3_s1(x, conv, *, relu, out_dtype=jnp.bfloat16):
    """3x3 / stride 1 / pad 1 conv: taps accumulated in-kernel from a single
    zero-padded, row-flattened copy of the input (no HBM im2col)."""
    B, H, W, C = x.shape
    OCp = conv["w"].shape[1]
    assert conv["w"].shape[0] == 9 * C
    w3 = conv["w"].reshape(9, C, OCp)
    bias2d = conv["b"].reshape(1, OCp).astype(jnp.float32)

    wp2 = W + 2
    m_wide = H * wp2
    # pad rows (1 top, 2 bottom) and cols (1, 1) so every tap offset of every
    # wide-output row stays in bounds after flattening.
    xp = jnp.pad(x.astype(jnp.bfloat16), ((0, 0), (1, 2), (1, 1), (0, 0)))
    xf = xp.reshape(B, (H + 3) * wp2, C)          # free bitcast reshape

    TN = OCp
    if B == 1 and OCp % 256 == 0:
        TN = OCp // 2                              # keep >= 2 parallel tiles
    nN = OCp // TN

    kernel = functools.partial(_conv3x3_kernel, m_wide=m_wide, wp2=wp2,
                               relu=relu)
    out = pl.pallas_call(
        kernel,
        out_shape=jax.ShapeDtypeStruct((B, m_wide, OCp), out_dtype),
        grid_spec=pltpu.PrefetchScalarGridSpec(
            num_scalar_prefetch=0,
            grid=(B, nN),
            in_specs=[
                pl.BlockSpec((1, (H + 3) * wp2, C), lambda b, j: (b, 0, 0)),
                pl.BlockSpec((9, C, TN), lambda b, j: (0, 0, j)),
                pl.BlockSpec((1, TN), lambda b, j: (0, j)),
            ],
            out_specs=pl.BlockSpec((1, m_wide, TN), lambda b, j: (b, 0, j)),
        ),
        compiler_params=_compiler_params(("parallel", "parallel")),
    )(xf, w3, bias2d)
    # drop the 2 garbage columns produced by the padded-width flattening
    return out.reshape(B, H, wp2, OCp)[:, :, :W, :]


# ------------------------------- max pooling --------------------------------

def _maxpool_kernel(ee_ref, eo_ref, oe_ref, oo_ref, o_ref):
    oh = o_ref.shape[1]
    ow = o_ref.shape[2]
    ee = ee_ref[0]
    eo = eo_ref[0]
    oe = oe_ref[0]
    oo = oo_ref[0]
    m = jnp.maximum
    top = m(m(ee[:oh, :ow], eo[:oh, :ow]), ee[:oh, 1:ow + 1])
    mid = m(m(oe[:oh, :ow], oo[:oh, :ow]), oe[:oh, 1:ow + 1])
    bot = m(m(ee[1:oh + 1, :ow], eo[1:oh + 1, :ow]), ee[1:oh + 1, 1:ow + 1])
    o_ref[0, :, :, :] = m(m(top, mid), bot)


def maxpool3x3_s2_p1(x):
    """MaxPool2d(3, stride=2, padding=1) via even/odd phase split: ~1x read +
    1x write HBM traffic instead of materializing 9 tap arrays."""
    B, H, W, C = x.shape
    OH = (H + 2 - 3) // 2 + 1
    OW = (W + 2 - 3) // 2 + 1
    pad_b = 2 * OH + 1 - H
    pad_r = 2 * OW + 1 - W
    p = jnp.pad(x, ((0, 0), (1, pad_b), (1, pad_r), (0, 0)),
                constant_values=-jnp.inf)
    ee = p[:, 0::2, 0::2, :]
    eo = p[:, 0::2, 1::2, :]
    oe = p[:, 1::2, 0::2, :]
    oo = p[:, 1::2, 1::2, :]
    # all phases have shape (B, OH+1, OW+1, C)
    phase_spec = pl.BlockSpec((1, OH + 1, OW + 1, C), lambda b: (b, 0, 0, 0))
    out = pl.pallas_call(
        _maxpool_kernel,
        out_shape=jax.ShapeDtypeStruct((B, OH, OW, C), x.dtype),
        grid=(B,),
        in_specs=[phase_spec] * 4,
        out_specs=pl.BlockSpec((1, OH, OW, C), lambda b: (b, 0, 0, 0)),
        compiler_params=_compiler_params(("parallel",)),
    )(ee, eo, oe, oo)
    return out


# ------------------------- conv dispatcher -----------------------------------

def conv2d(x, conv, *, stride, padding, relu, residual=None,
           out_dtype=jnp.bfloat16):
    """Conv2d on NHWC bf16 input, fused BN(bias)/ReLU/residual epilogue."""
    B, H, W, C = x.shape
    KH, KW = conv["kh"], conv["kw"]
    Kw, OCp = conv["w"].shape
    OH = (H + 2 * padding - KH) // stride + 1
    OW = (W + 2 * padding - KW) // stride + 1

    if (KH == 3 and KW == 3 and stride == 1 and padding == 1
            and residual is None and Kw == 9 * C):
        return conv3x3_s1(x, conv, relu=relu, out_dtype=out_dtype)

    if KH == 1 and KW == 1 and padding == 0:
        assert Kw == C, (Kw, C)
        if stride == 1:
            a = x.reshape(B * H * W, C)
        else:
            a = x[:, ::stride, ::stride, :].reshape(B * OH * OW, C)
    else:
        # TODO(synk): the 7x7/s2 stem and the three 3x3/s2 convs still build an
        # XLA im2col matrix; they are a small fraction of total HBM traffic.
        xp = jnp.pad(x, ((0, 0), (padding, padding), (padding, padding), (0, 0)))
        patches = [xp[:, kh:kh + stride * (OH - 1) + 1:stride,
                      kw:kw + stride * (OW - 1) + 1:stride, :]
                   for kh in range(KH) for kw in range(KW)]
        K = KH * KW * C
        if Kw > K:  # weight K dim was padded to a multiple of 128 (stem only)
            patches.append(jnp.zeros((B, OH, OW, Kw - K), x.dtype))
        a = jnp.concatenate(patches, axis=-1).reshape(B * OH * OW, Kw)

    res_mat = None
    if residual is not None:
        res_mat = residual.reshape(B * OH * OW, OCp)

    y = gemm_bias(a, conv["w"], conv["b"], relu=relu, residual=res_mat,
                  out_dtype=out_dtype)
    return y.reshape(B, OH, OW, OCp)


# ---------------------------- parameter creation -----------------------------

def _he_conv(key, oc, ic, k):
    fan_in = ic * k * k
    return jax.random.normal(key, (oc, ic, k, k), jnp.float32) * jnp.sqrt(2.0 / fan_in)


def _bn_affine(c):
    # eval-mode BatchNorm folded to per-channel scale/shift (default stats/affine)
    gamma = jnp.ones((c,), jnp.float32)
    beta = jnp.zeros((c,), jnp.float32)
    mean = jnp.zeros((c,), jnp.float32)
    var = jnp.ones((c,), jnp.float32)
    eps = 1e-5
    scale = gamma / jnp.sqrt(var + eps)
    shift = beta - mean * scale
    return scale, shift


def _prep_conv(w_oihw, scale, shift, in_cp, out_cp):
    """Fold BN scale into the weights, lay out as (Kp, OCp) bf16 + f32 bias."""
    OC, IC, KH, KW = w_oihw.shape
    w = w_oihw * scale[:, None, None, None]
    w = jnp.transpose(w, (2, 3, 1, 0))                        # KH, KW, IC, OC
    w = jnp.pad(w, ((0, 0), (0, 0), (0, in_cp - IC), (0, out_cp - OC)))
    wmat = w.reshape(KH * KW * in_cp, out_cp)
    Kp = _round_up(wmat.shape[0], 128)
    wmat = jnp.pad(wmat, ((0, Kp - wmat.shape[0]), (0, 0))).astype(jnp.bfloat16)
    b = jnp.pad(shift, (0, out_cp - OC)).astype(jnp.float32)
    return {"w": wmat, "b": b, "kh": KH, "kw": KW}


def make_params(key, embed_size):
    ki = iter(jax.random.split(key, 64))
    p = {"embed_size": embed_size}

    # Stem: Conv2d(3, 64, 7, stride=2, padding=3) + BN + ReLU  (out padded 64->128)
    p["stem"] = _prep_conv(_he_conv(next(ki), 64, 3, 7), *_bn_affine(64),
                           in_cp=3, out_cp=128)

    layers = []
    in_c, in_cp = 64, 128
    for width, nblocks, stride in ((64, 3, 1), (128, 4, 2), (256, 6, 2), (512, 3, 2)):
        w_cp = _cpad(width)
        blocks = []
        for bi in range(nblocks):
            s = stride if bi == 0 else 1
            out_c = width * 4
            out_cp = _cpad(out_c)
            blk = {"stride": s}
            blk["conv1"] = _prep_conv(_he_conv(next(ki), width, in_c, 1),
                                      *_bn_affine(width), in_cp, w_cp)
            blk["conv2"] = _prep_conv(_he_conv(next(ki), width, width, 3),
                                      *_bn_affine(width), w_cp, w_cp)
            blk["conv3"] = _prep_conv(_he_conv(next(ki), out_c, width, 1),
                                      *_bn_affine(out_c), w_cp, out_cp)
            if s != 1 or in_c != out_c:
                blk["ds"] = _prep_conv(_he_conv(next(ki), out_c, in_c, 1),
                                       *_bn_affine(out_c), in_cp, out_cp)
            blocks.append(blk)
            in_c, in_cp = out_c, out_cp
        layers.append(blocks)
    p["layers"] = layers

    # self.linear[0] = Conv2d(2048, embed_size, kernel_size=1) with bias, no BN
    embed_p = _cpad(embed_size)
    pw = jax.random.normal(next(ki), (embed_size, 2048, 1, 1), jnp.float32) \
        * (1.0 / jnp.sqrt(2048.0))
    pb = jax.random.normal(next(ki), (embed_size,), jnp.float32) * 0.01
    p["proj"] = _prep_conv(pw, jnp.ones((embed_size,), jnp.float32), pb,
                           2048, embed_p)
    return p


# --------------------------------- forward -----------------------------------

def _bottleneck(x, blk):
    s = blk["stride"]
    if "ds" in blk:
        identity = conv2d(x, blk["ds"], stride=s, padding=0, relu=False)
    else:
        identity = x
    out = conv2d(x, blk["conv1"], stride=1, padding=0, relu=True)
    out = conv2d(out, blk["conv2"], stride=s, padding=1, relu=True)
    # conv3 + BN + residual add + ReLU fused into one GEMM epilogue.
    out = conv2d(out, blk["conv3"], stride=1, padding=0, relu=True,
                 residual=identity)
    return out


def encoder_cnn_forward(images_nchw, params):
    # torch.no_grad() only affects autodiff, not forward values.
    x = jnp.transpose(images_nchw, (0, 2, 3, 1)).astype(jnp.bfloat16)  # NCHW->NHWC
    x = conv2d(x, params["stem"], stride=2, padding=3, relu=True)
    x = maxpool3x3_s2_p1(x)
    for blocks in params["layers"]:
        for blk in blocks:
            x = _bottleneck(x, blk)                       # (B, H/32, W/32, 2048)

    # Projection: 1x1 conv with bias, f32 output.
    y = conv2d(x, params["proj"], stride=1, padding=0, relu=False,
               out_dtype=jnp.float32)
    B, h, w, _ = y.shape
    embed = params["embed_size"]
    y = y[..., :embed]                                    # drop channel padding
    # TODO(synk): Dropout2d implemented as eval-mode identity (no training-mode channel dropout).
    y = jnp.transpose(y, (0, 3, 1, 2))                    # back to NCHW
    return y.reshape(B, embed, h * w)                     # features.view(B, C, -1)


if __name__ == "__main__":
    embed_size = 32
    key = jax.random.PRNGKey(0)
    k_params, k_img = jax.random.split(key)
    params = make_params(k_params, embed_size)
    images = jax.random.normal(k_img, (2, 3, 64, 64), jnp.float32)  # NCHW
    feats = encoder_cnn_forward(images, params)
    feats = jax.block_until_ready(feats)
    assert feats.shape == (2, embed_size, 4), feats.shape
    assert bool(jnp.all(jnp.isfinite(feats)))
    print("KERNEL_OK")
</pallas_src>

<mosaic_0001>
module attributes {stable_mosaic.version = 11 : i64} {
  func.func @_gemm_kernel(%arg0: i32, %arg1: i32, %arg2: memref<1024x256xbf16, #tpu.memory_space<vmem>>, %arg3: memref<256x128xbf16, #tpu.memory_space<vmem>>, %arg4: memref<1x128xf32, #tpu.memory_space<vmem>>, %arg5: memref<1024x128xbf16, #tpu.memory_space<vmem>>) attributes {dimension_semantics = [#tpu.dimension_semantics<parallel>, #tpu.dimension_semantics<parallel>], iteration_bounds = array<i64: 2, 1>, scalar_prefetch = 0 : i64, scratch_operands = 0 : i64, tpu.core_type = #tpu.core_type<tc>, window_params = [{transform_indices = @transform_0, window_bounds = array<i64: 1024, 256>}, {transform_indices = @transform_1, window_bounds = array<i64: 256, 128>}, {transform_indices = @transform_2, window_bounds = array<i64: 1, 128>}, {transform_indices = @transform_3, window_bounds = array<i64: 1024, 128>}]} {
    %c0 = arith.constant 0 : index
    %c0_0 = arith.constant 0 : index
    %0 = vector.load %arg2[%c0, %c0_0] : memref<1024x256xbf16, #tpu.memory_space<vmem>>, vector<1024x256xbf16>
    %c0_1 = arith.constant 0 : index
    %c0_2 = arith.constant 0 : index
    %1 = vector.load %arg3[%c0_1, %c0_2] : memref<256x128xbf16, #tpu.memory_space<vmem>>, vector<256x128xbf16>
    %cst = arith.constant dense<0.000000e+00> : vector<1024x128xf32>
    %2 = tpu.matmul %0, %1, %cst {dimension_numbers = #tpu.dot_dimension_numbers<[1], [0], [0], [1], [0, 0, 1, 1], [], []>} : vector<1024x256xbf16>, vector<256x128xbf16>, vector<1024x128xf32> -> vector<1024x128xf32>
    %c0_3 = arith.constant 0 : index
    %c0_4 = arith.constant 0 : index
    %3 = vector.load %arg4[%c0_3, %c0_4] : memref<1x128xf32, #tpu.memory_space<vmem>>, vector<1x128xf32>
    %4 = vector.broadcast %3 : vector<1x128xf32> to vector<1024x128xf32>
    %5 = arith.addf %2, %4 : vector<1024x128xf32>
    %cst_5 = arith.constant 0.000000e+00 : f32
    %6 = vector.broadcast %cst_5 : f32 to vector<1024x128xf32>
    %7 = arith.maximumf %5, %6 : vector<1024x128xf32>
    %8 = arith.truncf %7 : vector<1024x128xf32> to vector<1024x128xbf16>
    %c0_6 = arith.constant 0 : index
    %c0_7 = arith.constant 0 : index
    %9 = vector.load %arg5[%c0_6, %c0_7] : memref<1024x128xbf16, #tpu.memory_space<vmem>>, vector<1024x128xbf16>
    tpu.vector_store %arg5[%c0_6, %c0_7], %8 {strides = array<i32>} : memref<1024x128xbf16, #tpu.memory_space<vmem>>, vector<1024x128xbf16>,
    return
  }
  func.func @transform_0(%arg0: i32, %arg1: i32) -> (i32, i32) {
    %c0_i32 = arith.constant 0 : i32
    %c0_i32_0 = arith.constant 0 : i32
    return %arg0, %c0_i32 : i32, i32
  }
  func.func @transform_1(%arg0: i32, %arg1: i32) -> (i32, i32) {
    %c0_i32 = arith.constant 0 : i32
    %c0_i32_0 = arith.constant 0 : i32
    return %c0_i32, %arg1 : i32, i32
  }
  func.func @transform_2(%arg0: i32, %arg1: i32) -> (i32, i32) {
    %c0_i32 = arith.constant 0 : i32
    %c0_i32_0 = arith.constant 0 : i32
    return %c0_i32, %arg1 : i32, i32
  }
  func.func @transform_3(%arg0: i32, %arg1: i32) -> (i32, i32) {
    %c0_i32 = arith.constant 0 : i32
    return %arg0, %arg1 : i32, i32
  }
}

</mosaic_0001>

<bundles_post_ra>
// kernel: tpu_custom_call.1
= control target key start
LH: loop header
LB: loop body
LE: loop exit
PB: predicated region body
PF: predicated region fallthrough
CT: control target
= control target key end

     0   :  { %8 = vsyncpa [#allocation3], 0  ;;  %s4471_s0 = inlined_call_operand.hbm [shape: bf16[2048,256], index: 0, kind: input, shape index: {}]   ;;  %s4472_s1 = inlined_call_operand.hbm [shape: bf16[256,128], index: 1, kind: input, shape index: {}]   ;;  %s4473_s2 = inlined_call_operand.vmem [shape: f32[1,128], index: 2, kind: input, shape index: {}]   ;;  %s4474_s3 = inlined_call_operand.hbm [shape: bf16[2048,128], index: 3, kind: output, shape index: {}]  }
   0x1   :  { %10 = vsyncpa [#allocation3 + $0x1], 0 }
   0x2   :  { %11 = vsyncpa [#allocation6], 0 }
   0x3   :  { %12 = vsyncpa [#allocation4], 0 }
   0x4   :  { %14 = vsyncpa [#allocation4 + $0x1], 0  ;;  %s3884_s12 = smov 0   ;;  %s3886_s13 = smov 0  }
   0x5   :  { %s3888_s14 = smov 0   ;;  %s3890_s15 = smov 0  }
   0x6   :  { %s3892_s16 = smov 0   ;;  %s3894_s17 = smov 0  }
   0x7 LB: > { %s2581_s18 = sadd.s32 4294967295, %s3852_s17   ;;  %s2582_s19 = sadd.s32 4294967294, %s3852_s17   ;;  %s3852_s17 = sphi %s3894_s17, %s20_s17   ;;  %s3848_s16 = sphi %s3892_s16, %s4498_s16   ;;  %s3844_s15 = sphi %s3890_s15, %s4497_s15   ;;  %s3840_s14 = sphi %s3888_s14, %s4496_s14   ;;  %s3836_s13 = sphi %s3886_s13, %s4495_s13   ;;  %s3832_s12 = sphi %s3884_s12, %s4494_s12  }
   0x8   : > { %p52_p0 = scmp.ne.s32.totalorder %s3836_s13, %s3832_s12  ;;  %p3918_p1 = scmp.eq.s32.totalorder %s2581_s18, 0 }
   0x9   : > { %p3922_p2 = scmp.eq.s32.totalorder %s2581_s18, 1  ;;  %p136_p3 = scmp.eq.s32.totalorder %s2582_s19, 1 }
   0xa   : > { %s4479_s20 = scalar_select %p3918_p1, 1, 0 }
   0xb   : > { %s4480_s21 = scalar_select %p3922_p2, 1, 0 }
   0xc   : > { %p3928_p4 = por %p3918_p1, %p52_p0  ;;  %p2583_p5 = scmp.ge.s32.totalorder %s3852_s17, 1 }
   0xd   : > { %p3933_p6 = por %p136_p3, %p52_p0  ;;  %p143_p7 = scmp.lt.s32.totalorder %s3852_s17, 3 }
   0xe   : > { %s4481_s22 = scalar_select %p3928_p4, 1, 0 }
   0xf   : > { %s4482_s23 = scalar_select %p3933_p6, 1, 0 }
  0x10   : > { %p3938_p8 = pnand %p2583_p5, %p143_p7  ;;  %s3854_s25 = smov [#allocation5]  }
  0x11   : > { %s157_s26 = sshll.u32 %s3854_s25, 4  ;;  %s32_s28 = sadd.s32 1, %s3848_s16  ;;  %s158_s26 = int_to_ptr.vmem [resolvable:$true] %s157_s26 }
  0x12   : > { %s4483_s24 = scalar_select %p3938_p8, 1, 0 }
  0x13   : > { %p3427_p9 = pneg %p3938_p8  ;;  %s3708_s4 = scalar_lea.hbm %s4472_s1, 2048 }
  0x14   : > { %p3709_p12 = scmp.ne.s32.totalorder %s4472_s1, %s3708_s4  ;;  %p3715_p5 = scmp.lt.u32.totalorder %s3708_s4, %s4472_s1 }
  0x15   : > { %p3947_p11 = pnand %p3427_p9, %p3918_p1 }
  0x17   : > { %p3710_p13 = pneg %p3947_p11 }
  0x19   : > { %p3711_p0 = pnand %p3710_p13, %p3709_p12 }
  0x1b   : > { %p3712_p3 = pneg %p3711_p0 }
  0x1d   : > { %p3717_p7 = pnand %p3715_p5, %p3712_p3 }
  0x1f   : > { %3720 = shalt.err (!%p3717_p7)
}
  0x20   : > { %s3721_s9 = scalar_lea.vmem %s158_s26, 2048  ;;  %p3729_p1 = scmp.lt.s32.totalorder %s158_s26, %s158_s26 }
  0x21   : > { %p3722_p9 = scmp.ne.s32.totalorder %s158_s26, %s3721_s9  ;;  %p3730_p4 = scmp.lt.s32.totalorder %s3721_s9, %s3721_s9 }
  0x23   : > { %p3724_p10 = pnand %p3722_p9, %p3710_p13  ;;  %p3731_p8 = por %p3730_p4, %p3729_p1 }
  0x25   : > { %p3725_p6 = pneg %p3724_p10 }
  0x27   : > { %p3732_p2 = pnand %p3731_p8, %p3725_p6 }
  0x29   : > { %3735 = shalt.err (!%p3732_p2)
}
  0x2a   : > { %s3855_s10 = smov 64   ;;  %s3856_s11 = smov 4  }
  0x2b   : > { %3430 = dma.hbm_to_vmem [thread:$0]  (!%p3947_p11), %s4472_s1, 2048, %s158_s26, [#allocation6], %s3855_s10, %s3855_s10, %s3856_s11  }
  0x2c   : > { %p34_p1 = scmp.ge.s32.totalorder %s32_s28, 2  ;;  %s39_s25 = sadd.s32 1, %s3840_s14 }
  0x2d   : > { %p46_p2 = scmp.ne.s32.totalorder %s3840_s14, %s3836_s13  ;;  %p47_p4 = scmp.eq.s32.totalorder %s3852_s17, 0 }
  0x2e   : > { %s4500_s28 = smov (%p34_p1, %s32_s28), 0  ;;  %p4486_p8 = scmp.ne.s32.totalorder %s4480_s21, 0 }
  0x2f   : > { %p3974_p6 = por %p47_p4, %p46_p2  ;;  %s36_s27 = ssub.s32 %s3848_s16, %s4500_s28 }
  0x30   : > { %p3980_p10 = por %p4486_p8, %p46_p2  ;;  %p3440_p12 = scmp.lt.s32.totalorder %s3852_s17, 2 }
  0x31   : > { %p37_p11 = scmp.eq.s32.totalorder %s36_s27, 0  ;;  %s177_s26 = sand.u32 1, %s3840_s14  }
  0x32   : > { %s2587_s4 = sshll.u32 %s177_s26, 10  ;;  %s2874_s6 = sshll.u32 %s3848_s16, 14 }
  0x33   : > { %s3989_s5 = scalar_select %p37_p11, %s3840_s14, %s39_s25  }
  0x34   : > { %s3995_s9 = scalar_lea.hbm %s4471_s0, %s2874_s6  ;;  %s181_s21 = scalar_lea.vmem [#allocation2], %s2587_s4 }
  0x35   : > { %s189_s10 = sshll.u32 %s181_s21, 4  ;;  %p4001_p13 = pnand %p3440_p12, %p3974_p6  ;;  %s3997_s10 = int_to_ptr.vmem [resolvable:$true] %s189_s10 }
  0x36   : > { %s4005_s18 = scalar_lea.sflag [#allocation3], %s177_s26  ;;  %s3736_s19 = scalar_lea.hbm %s3995_s9, 16384 }
  0x37   : > { %p3737_p0 = scmp.ne.s32.totalorder %s3995_s9, %s3736_s19  ;;  %p3738_p3 = pneg %p4001_p13 }
  0x38   : > { %s3741_s29 = scalar_lea.hbm %s4471_s0, 32768  ;;  %p3742_p9 = scmp.lt.u32.totalorder %s3995_s9, %s4471_s0 }
  0x39   : > { %p3739_p5 = pnand %p3738_p3, %p3737_p0  ;;  %p3743_p1 = scmp.lt.u32.totalorder %s3741_s29, %s3736_s19 }
  0x3a   : > { %p3745_p4 = scmp.lt.u32.totalorder %s3736_s19, %s3995_s9 }
  0x3b   : > { %p3740_p7 = pneg %p3739_p5  ;;  %p3744_p2 = por %p3743_p1, %p3742_p9 }
  0x3d   : > { %p3746_p6 = por %p3745_p4, %p3744_p2 }
  0x3f   : > { %p3747_p8 = pnand %p3746_p6, %p3740_p7 }
  0x41   : > { %3750 = shalt.err (!%p3747_p8)
}
  0x42   : > { %s3751_s26 = scalar_lea.vmem %s3997_s10, 16384  ;;  %s3857_s7 = smov [#allocation2]  }
  0x43   : > { %p3752_p12 = scmp.ne.s32.totalorder %s3997_s10, %s3751_s26  ;;  %s3756_s8 = sshll.u32 %s3857_s7, 4  ;;  %s3757_s8 = int_to_ptr.vmem [resolvable:$false] %s3756_s8 }
  0x44   : > { %s3758_s21 = scalar_lea.vmem %s3757_s8, 32768  ;;  %p3759_p5 = scmp.lt.s32.totalorder %s3997_s10, %s3757_s8 }
  0x45   : > { %p3754_p11 = pnand %p3752_p12, %p3738_p3  ;;  %p3760_p9 = scmp.lt.s32.totalorder %s3758_s21, %s3751_s26 }
  0x47   : > { %p3755_p0 = pneg %p3754_p11  ;;  %p3761_p1 = por %p3760_p9, %p3759_p5 }
  0x49   : > { %p3762_p2 = pnand %p3761_p1, %p3755_p0 }
  0x4b   : > { %3765 = shalt.err (!%p3762_p2)
}
  0x4c   : > { %s3858_s19 = smov 128   ;;  %s3859_s25 = smov 8  }
  0x4d   : > { %3434 = dma.hbm_to_vmem [thread:$0]  (!%p4001_p13), %s3995_s9, 16384, %s3997_s10, %s4005_s18, %s3858_s19, %s3858_s19, %s3859_s25  }
  0x4e   : > { %p4489_p3 = scmp.ne.s32.totalorder %s4483_s24, 0 }
  0x4f   : > { %s4036_s27 = sand.u32 (!%p4489_p3), 1, %s3836_s13   ;;  %p4490_p7 = scmp.ne.s32.totalorder (!%p4489_p3), %s4481_s22, 0 }
  0x50   : > { %201 = sbr.rel (%p4489_p3) target bundleno = 639 (0x27f), region = 32  ;;  %s2592_s29 = sshll.u32 (!%p4489_p3), %s4036_s27, 10 }
  0x51   : > { %s204_s4 = scalar_lea.sflag (!%p4489_p3), [#allocation3], %s4036_s27  ;;  %s4040_s6 = scalar_lea.vmem (!%p4489_p3), [#allocation2], %s2592_s29 }
  0x57   : > { %3819 = dma.done.wait (%p4490_p7), %s204_s4, 16384  }
  0x58   : > { %3821 = vsyncadd (%p4490_p7), %s204_s4, 4294950912  ;;  %p4491_p13 = scmp.ne.s32.totalorder %s4479_s20, 0 }
  0x5a   : > { %3823 = dma.done.wait (%p4491_p13), [#allocation6], 2048  }
  0x5b   : > { %3825 = vsyncadd (%p4491_p13), [#allocation6], 4294965248  ;;  %v3860_v0 = vmov 0   ;;  %v3499_v1 = vld [vmem:[#allocation5] sm:$0xff]   ;;  %v3500_v2 = vld [vmem:[#allocation5 + $0x8] sm:$0xff]   ;;  %s2594_s24 = sshll.u32 %s4036_s27, 9 }
  0x5c   : > { %1146 = vmatprep.subr.bf16.mxu0 %v3860_v0  ;;  %3387 = vmatprep.subr.bf16.mxu1 %v3860_v0  ;;  %v3501_v3 = vld [vmem:[#allocation5 + $0x10] sm:$0xff]   ;;  %v3502_v4 = vld [vmem:[#allocation5 + $0x18] sm:$0xff]   ;;  %v3503_v5 = vld [vmem:[#allocation5 + $0x20] sm:$0xff]   ;;  %s4206_s9 = scalar_lea.vmem [#allocation7], %s2594_s24  ;;  %s3003_s18 = sshll.u32 %s3844_s15, 13 }
  0x5d   : > { %1147 = vmatpush1.bf16.msra.mxu0 %v3499_v1  ;;  %3403 = vmatpush1.bf16.msra.mxu1 %v3499_v1  ;;  %v3517_v6 = vld [vmem:[%s4040_s6 + $0x4] ss:$8 sps:$4 sm:$0xff]   ;;  %v3505_v9 = vld [vmem:[#allocation5 + $0x30] sm:$0xff]   ;;  %v3506_v10 = vld [vmem:[#allocation5 + $0x38] sm:$0xff]   ;;  %s2474_s26 = sshll.u32 %s4206_s9, 4  ;;  %s4418_s21 = scalar_lea.hbm %s4474_s3, %s3003_s18  ;;  %s4420_s26 = int_to_ptr.vmem [resolvable:$true] %s2474_s26 }
  0x5e   : > { %1148 = vmatprep.subr.bf16.mxu0 %v3860_v0  ;;  %3388 = vmatprep.subr.bf16.mxu1 %v3860_v0  ;;  %v3504_v7 = vld [vmem:[#allocation5 + $0x28] sm:$0xff]   ;;  %v3507_v11 = vld [vmem:[#allocation5 + $0x40] sm:$0xff]   ;;  %v3509_v13 = vld [vmem:[#allocation5 + $0x50] sm:$0xff]   ;;  %s2460_s15 = scalar_lea.sflag [#allocation4], %s4036_s27  ;;  %s3766_s19 = scalar_lea.vmem %s4420_s26, 8192 }
  0x5f   : > { %v3520_v8 = vld [vmem:[%s4040_s6 + $0x204] ss:$8 sps:$4 sm:$0xff]   ;;  %1178 = vmatprep.mubr.bf16.mxu0 %v3517_v6  ;;  %v3510_v14 = vld [vmem:[#allocation5 + $0x58] sm:$0xff]   ;;  %v3513_v17 = vld [vmem:[#allocation5 + $0x70] sm:$0xff]   ;;  %p3767_p4 = scmp.ne.s32.totalorder %s4420_s26, %s3766_s19  ;;  %s3861_s25 = smov [#allocation7]  }
  0x60   : > { %1434 = vmatprep.mubr.bf16.mxu1 %v3520_v8  ;;  %v3508_v12 = vld [vmem:[#allocation5 + $0x48] sm:$0xff]   ;;  %v3511_v15 = vld [vmem:[#allocation5 + $0x60] sm:$0xff]   ;;  %v3514_v18 = vld [vmem:[#allocation5 + $0x78] sm:$0xff]   ;;  %s3770_s29 = sshll.u32 %s3861_s25, 4  ;;  %s3771_s29 = int_to_ptr.vmem [resolvable:$false] %s3770_s29 }
  0x61   : > { %1149 = vmatpush1.bf16.msra.mxu0 %v3500_v2  ;;  %3404 = vmatpush1.bf16.msra.mxu1 %v3500_v2  ;;  %v3512_v16 = vld [vmem:[#allocation5 + $0x68] sm:$0xff]   ;;  %v3521_v21 = vld [vmem:[%s4040_s6 + $0x14] ss:$8 sps:$4 sm:$0xff]   ;;  %v3525_v23 = vld [vmem:[%s4040_s6 + $0x10] ss:$8 sps:$4 sm:$0xff]   ;;  %p3768_p6 = pnand %p3767_p4, %p3980_p10  ;;  %s3772_s4 = scalar_lea.vmem %s3771_s29, 16384 }
  0x62   : > { %1150 = vmatprep.subr.bf16.mxu0 %v3860_v0  ;;  %3389 = vmatprep.subr.bf16.mxu1 %v3860_v0  ;;  %v3515_v19 = vld [vmem:[%s4040_s6] ss:$8 sps:$4 sm:$0xff]   ;;  %v3523_v22 = vld [vmem:[%s4040_s6 + $0x214] ss:$8 sps:$4 sm:$0xff]   ;;  %v3526_v24 = vld [vmem:[%s4040_s6 + $0x210] ss:$8 sps:$4 sm:$0xff]   ;;  %p3773_p12 = scmp.lt.s32.totalorder %s4420_s26, %s3771_s29  ;;  %p3774_p11 = scmp.lt.s32.totalorder %s3772_s4, %s3766_s19 }
  0x63   : > { %v3518_v20 = vld [vmem:[%s4040_s6 + $0x200] ss:$8 sps:$4 sm:$0xff]   ;;  %v3527_v25 = vld [vmem:[%s4040_s6 + $0x24] ss:$8 sps:$4 sm:$0xff]   ;;  %v3533_v29 = vld [vmem:[%s4040_s6 + $0x34] ss:$8 sps:$4 sm:$0xff]   ;;  %p3769_p8 = pneg %p3768_p6 }
  0x64   : > { %v3529_v26 = vld [vmem:[%s4040_s6 + $0x224] ss:$8 sps:$4 sm:$0xff]   ;;  %v3531_v27 = vld [vmem:[%s4040_s6 + $0x20] ss:$8 sps:$4 sm:$0xff]   ;;  %v3535_v30 = vld [vmem:[%s4040_s6 + $0x234] ss:$8 sps:$4 sm:$0xff]   ;;  %p3775_p0 = por %p3774_p11, %p3773_p12 }
  0x65   : > { %1151 = vmatpush1.bf16.msra.mxu0 %v3501_v3  ;;  %3405 = vmatpush1.bf16.msra.mxu1 %v3501_v3  ;;  %v3532_v28 = vld [vmem:[%s4040_s6 + $0x220] ss:$8 sps:$4 sm:$0xff]   ;;  %v3537_v31 = vld [vmem:[%s4040_s6 + $0x30] ss:$8 sps:$4 sm:$0xff]   ;;  %v3539_v33 = vld [vmem:[%s4040_s6 + $0x44] ss:$8 sps:$4 sm:$0xff]  }
  0x66   : > { %1152 = vmatprep.subr.bf16.mxu0 %v3860_v0  ;;  %3390 = vmatprep.subr.bf16.mxu1 %v3860_v0  ;;  %v3538_v32 = vld [vmem:[%s4040_s6 + $0x230] ss:$8 sps:$4 sm:$0xff]   ;;  %v3541_v34 = vld [vmem:[%s4040_s6 + $0x244] ss:$8 sps:$4 sm:$0xff]   ;;  %v3543_v35 = vld [vmem:[%s4040_s6 + $0x40] ss:$8 sps:$4 sm:$0xff]   ;;  %p3776_p5 = pnand %p3775_p0, %p3769_p8 }
  0x67   : > { %v3544_v36 = vld [vmem:[%s4040_s6 + $0x240] ss:$8 sps:$4 sm:$0xff]   ;;  %v3545_v37 = vld [vmem:[%s4040_s6 + $0x54] ss:$8 sps:$4 sm:$0xff]   ;;  %v3549_v39 = vld [vmem:[%s4040_s6 + $0x50] ss:$8 sps:$4 sm:$0xff]  }
  0x68   : > { %v3547_v38 = vld [vmem:[%s4040_s6 + $0x254] ss:$8 sps:$4 sm:$0xff]   ;;  %v3550_v40 = vld [vmem:[%s4040_s6 + $0x250] ss:$8 sps:$4 sm:$0xff]   ;;  %v3551_v41 = vld [vmem:[%s4040_s6 + $0x64] ss:$8 sps:$4 sm:$0xff]  }
  0x69   : > { %1153 = vmatpush1.bf16.msra.mxu0 %v3502_v4  ;;  %3406 = vmatpush1.bf16.msra.mxu1 %v3502_v4  ;;  %v3553_v42 = vld [vmem:[%s4040_s6 + $0x264] ss:$8 sps:$4 sm:$0xff]   ;;  %v3555_v43 = vld [vmem:[%s4040_s6 + $0x60] ss:$8 sps:$4 sm:$0xff]   ;;  %v3557_v45 = vld [vmem:[%s4040_s6 + $0x74] ss:$8 sps:$4 sm:$0xff]  }
  0x6a   : > { %1154 = vmatprep.subr.bf16.mxu0 %v3860_v0  ;;  %3391 = vmatprep.subr.bf16.mxu1 %v3860_v0  ;;  %v3556_v44 = vld [vmem:[%s4040_s6 + $0x260] ss:$8 sps:$4 sm:$0xff]   ;;  %v3559_v46 = vld [vmem:[%s4040_s6 + $0x274] ss:$8 sps:$4 sm:$0xff]   ;;  %v3561_v47 = vld [vmem:[%s4040_s6 + $0x70] ss:$8 sps:$4 sm:$0xff]  }
  0x6b   : > { %v3562_v48 = vld [vmem:[%s4040_s6 + $0x270] ss:$8 sps:$4 sm:$0xff]   ;;  %v3563_v49 = vld [vmem:[%s4040_s6 + $0x84] ss:$8 sps:$4 sm:$0xff]   ;;  %v3567_v51 = vld [vmem:[%s4040_s6 + $0x80] ss:$8 sps:$4 sm:$0xff]  }
  0x6c   : > { %v3565_v50 = vld [vmem:[%s4040_s6 + $0x284] ss:$8 sps:$4 sm:$0xff]   ;;  %v3568_v52 = vld [vmem:[%s4040_s6 + $0x280] ss:$8 sps:$4 sm:$0xff]   ;;  %v3569_v53 = vld [vmem:[%s4040_s6 + $0x94] ss:$8 sps:$4 sm:$0xff]  }
  0x6d   : > { %1155 = vmatpush1.bf16.msra.mxu0 %v3503_v5  ;;  %3407 = vmatpush1.bf16.msra.mxu1 %v3503_v5  ;;  %v3571_v54 = vld [vmem:[%s4040_s6 + $0x294] ss:$8 sps:$4 sm:$0xff]   ;;  %v3573_v55 = vld [vmem:[%s4040_s6 + $0x90] ss:$8 sps:$4 sm:$0xff]   ;;  %v3575_v57 = vld [vmem:[%s4040_s6 + $0xa4] ss:$8 sps:$4 sm:$0xff]  }
  0x6e   : > { %1156 = vmatprep.subr.bf16.mxu0 %v3860_v0  ;;  %3392 = vmatprep.subr.bf16.mxu1 %v3860_v0  ;;  %v3574_v56 = vld [vmem:[%s4040_s6 + $0x290] ss:$8 sps:$4 sm:$0xff]   ;;  %v3577_v58 = vld [vmem:[%s4040_s6 + $0x2a4] ss:$8 sps:$4 sm:$0xff]   ;;  %v3579_v59 = vld [vmem:[%s4040_s6 + $0xa0] ss:$8 sps:$4 sm:$0xff]  }
  0x6f   : > { %v3580_v60 = vld [vmem:[%s4040_s6 + $0x2a0] ss:$8 sps:$4 sm:$0xff]   ;;  %v3581_v61 = vld [vmem:[%s4040_s6 + $0xb4] ss:$8 sps:$4 sm:$0xff]   ;;  %v3585_v63 = vld [vmem:[%s4040_s6 + $0xb0] ss:$8 sps:$4 sm:$0xff]  }
  0x70   : > { %v3583_v62 = vld [vmem:[%s4040_s6 + $0x2b4] ss:$8 sps:$4 sm:$0xff]   ;;  %v3587_v1 = vld [vmem:[%s4040_s6 + $0xc4] ss:$8 sps:$4 sm:$0xff]   ;;  %v3591_v3 = vld [vmem:[%s4040_s6 + $0xc0] ss:$8 sps:$4 sm:$0xff]  }
  0x71   : > { %1157 = vmatpush1.bf16.msra.mxu0 %v3504_v7  ;;  %3408 = vmatpush1.bf16.msra.mxu1 %v3504_v7  ;;  %v3589_v2 = vld [vmem:[%s4040_s6 + $0x2c4] ss:$8 sps:$4 sm:$0xff]   ;;  %v3592_v4 = vld [vmem:[%s4040_s6 + $0x2c0] ss:$8 sps:$4 sm:$0xff]   ;;  %v3593_v5 = vld [vmem:[%s4040_s6 + $0xd4] ss:$8 sps:$4 sm:$0xff]  }
  0x72   : > { %1158 = vmatprep.subr.bf16.mxu0 %v3860_v0  ;;  %3393 = vmatprep.subr.bf16.mxu1 %v3860_v0  ;;  %v3595_v6 = vld [vmem:[%s4040_s6 + $0x2d4] ss:$8 sps:$4 sm:$0xff]   ;;  %v3597_v7 = vld [vmem:[%s4040_s6 + $0xd0] ss:$8 sps:$4 sm:$0xff]  }
  0x73   : > { %v3598_v8 = vld [vmem:[%s4040_s6 + $0x2d0] ss:$8 sps:$4 sm:$0xff]  }
  0x75   : > { %1159 = vmatpush1.bf16.msra.mxu0 %v3505_v9  ;;  %3409 = vmatpush1.bf16.msra.mxu1 %v3505_v9  ;;  %v3599_v9 = vld [vmem:[%s4040_s6 + $0xe4] ss:$8 sps:$4 sm:$0xff]  }
  0x76   : > { %1160 = vmatprep.subr.bf16.mxu0 %v3860_v0  ;;  %3394 = vmatprep.subr.bf16.mxu1 %v3860_v0 }
  0x79   : > { %1161 = vmatpush1.bf16.msra.mxu0 %v3506_v10  ;;  %3410 = vmatpush1.bf16.msra.mxu1 %v3506_v10  ;;  %v3601_v10 = vld [vmem:[%s4040_s6 + $0x2e4] ss:$8 sps:$4 sm:$0xff]  }
  0x7a   : > { %1162 = vmatprep.subr.bf16.mxu0 %v3860_v0  ;;  %3395 = vmatprep.subr.bf16.mxu1 %v3860_v0 }
  0x7d   : > { %1163 = vmatpush1.bf16.msra.mxu0 %v3507_v11  ;;  %3411 = vmatpush1.bf16.msra.mxu1 %v3507_v11  ;;  %v3603_v11 = vld [vmem:[%s4040_s6 + $0xe0] ss:$8 sps:$4 sm:$0xff]  }
  0x7e   : > { %1164 = vmatprep.subr.bf16.mxu0 %v3860_v0  ;;  %3396 = vmatprep.subr.bf16.mxu1 %v3860_v0 }
  0x81   : > { %1165 = vmatpush1.bf16.msra.mxu0 %v3508_v12  ;;  %3412 = vmatpush1.bf16.msra.mxu1 %v3508_v12  ;;  %v3604_v12 = vld [vmem:[%s4040_s6 + $0x2e0] ss:$8 sps:$4 sm:$0xff]  }
  0x82   : > { %1166 = vmatprep.subr.bf16.mxu0 %v3860_v0  ;;  %3397 = vmatprep.subr.bf16.mxu1 %v3860_v0 }
  0x85   : > { %1167 = vmatpush1.bf16.msra.mxu0 %v3509_v13  ;;  %3413 = vmatpush1.bf16.msra.mxu1 %v3509_v13  ;;  %v3605_v13 = vld [vmem:[%s4040_s6 + $0xf4] ss:$8 sps:$4 sm:$0xff]  }
  0x86   : > { %1168 = vmatprep.subr.bf16.mxu0 %v3860_v0  ;;  %3398 = vmatprep.subr.bf16.mxu1 %v3860_v0 }
  0x89   : > { %1169 = vmatpush1.bf16.msra.mxu0 %v3510_v14  ;;  %3414 = vmatpush1.bf16.msra.mxu1 %v3510_v14  ;;  %v3607_v14 = vld [vmem:[%s4040_s6 + $0x2f4] ss:$8 sps:$4 sm:$0xff]  }
  0x8a   : > { %1170 = vmatprep.subr.bf16.mxu0 %v3860_v0  ;;  %3399 = vmatprep.subr.bf16.mxu1 %v3860_v0 }
  0x8d   : > { %1171 = vmatpush1.bf16.msra.mxu0 %v3511_v15  ;;  %3415 = vmatpush1.bf16.msra.mxu1 %v3511_v15  ;;  %v3609_v15 = vld [vmem:[%s4040_s6 + $0xf0] ss:$8 sps:$4 sm:$0xff]  }
  0x8e   : > { %1172 = vmatprep.subr.bf16.mxu0 %v3860_v0  ;;  %3400 = vmatprep.subr.bf16.mxu1 %v3860_v0 }
  0x91   : > { %1173 = vmatpush1.bf16.msra.mxu0 %v3512_v16  ;;  %3416 = vmatpush1.bf16.msra.mxu1 %v3512_v16  ;;  %v3610_v16 = vld [vmem:[%s4040_s6 + $0x2f0] ss:$8 sps:$4 sm:$0xff]  }
  0x92   : > { %1174 = vmatprep.subr.bf16.mxu0 %v3860_v0  ;;  %3401 = vmatprep.subr.bf16.mxu1 %v3860_v0 }
  0x95   : > { %1175 = vmatpush1.bf16.msra.mxu0 %v3513_v17  ;;  %3417 = vmatpush1.bf16.msra.mxu1 %v3513_v17  ;;  %v3611_v17 = vld [vmem:[%s4040_s6 + $0x104] ss:$8 sps:$4 sm:$0xff]  }
  0x96   : > { %1176 = vmatprep.subr.bf16.mxu0 %v3860_v0  ;;  %3402 = vmatprep.subr.bf16.mxu1 %v3860_v0  ;;  %v3586_v0 = vld [vmem:[%s4040_s6 + $0x2b0] ss:$8 sps:$4 sm:$0xff]  }
  0x99   : > { %1177 = vmatpush1.bf16.msra.mxu0 %v3514_v18  ;;  %3418 = vmatpush1.bf16.msra.mxu1 %v3514_v18  ;;  %v3613_v18 = vld [vmem:[%s4040_s6 + $0x304] ss:$8 sps:$4 sm:$0xff]  }
  0x9c   : > { %1179 = vmatmul.mubr.bf16.vlgmr.msra.gmra.mrb[0].mxu0 %v3515_v19  ;;  %1435 = vmatmul.mubr.bf16.vlgmr.msra.gmra.mrb[0].mxu1 %v3518_v20  ;;  %v3615_v19 = vld [vmem:[%s4040_s6 + $0x100] ss:$8 sps:$4 sm:$0xff]  }
  0x9d   : > { %1186 = vmatprep.mubr.bf16.mxu0 %v3521_v21  ;;  %1442 = vmatprep.mubr.bf16.mxu1 %v3523_v22  ;;  %v3616_v20 = vld [vmem:[%s4040_s6 + $0x300] ss:$8 sps:$4 sm:$0xff]   ;;  %v3617_v21 = vld [vmem:[%s4040_s6 + $0x114] ss:$8 sps:$4 sm:$0xff]  }
  0x9e   : > { %v3619_v22 = vld [vmem:[%s4040_s6 + $0x314] ss:$8 sps:$4 sm:$0xff]  }
  0xa4   : > { %1187 = vmatmul.mubr.bf16.gmra.mrb[4].mxu0 %v3525_v23  ;;  %1443 = vmatmul.mubr.bf16.gmra.mrb[4].mxu1 %v3526_v24  ;;  %v3621_v23 = vld [vmem:[%s4040_s6 + $0x110] ss:$8 sps:$4 sm:$0xff]  }
  0xa5   : > { %1194 = vmatprep.mubr.bf16.mxu0 %v3527_v25  ;;  %1450 = vmatprep.mubr.bf16.mxu1 %v3529_v26  ;;  %v3622_v24 = vld [vmem:[%s4040_s6 + $0x310] ss:$8 sps:$4 sm:$0xff]   ;;  %v3623_v25 = vld [vmem:[%s4040_s6 + $0x124] ss:$8 sps:$4 sm:$0xff]  }
  0xa6   : > { %v3625_v26 = vld [vmem:[%s4040_s6 + $0x324] ss:$8 sps:$4 sm:$0xff]  }
  0xac   : > { %1195 = vmatmul.mubr.bf16.gmra.mrb[8].mxu0 %v3531_v27  ;;  %1451 = vmatmul.mubr.bf16.gmra.mrb[8].mxu1 %v3532_v28  ;;  %v3627_v27 = vld [vmem:[%s4040_s6 + $0x120] ss:$8 sps:$4 sm:$0xff]  }
  0xad   : > { %1202 = vmatprep.mubr.bf16.mxu0 %v3533_v29  ;;  %1458 = vmatprep.mubr.bf16.mxu1 %v3535_v30  ;;  %v3628_v28 = vld [vmem:[%s4040_s6 + $0x320] ss:$8 sps:$4 sm:$0xff]   ;;  %v3629_v29 = vld [vmem:[%s4040_s6 + $0x134] ss:$8 sps:$4 sm:$0xff]  }
  0xae   : > { %v3631_v30 = vld [vmem:[%s4040_s6 + $0x334] ss:$8 sps:$4 sm:$0xff]  }
  0xb4   : > { %1203 = vmatmul.mubr.bf16.gmra.mrb[12].mxu0 %v3537_v31  ;;  %1459 = vmatmul.mubr.bf16.gmra.mrb[12].mxu1 %v3538_v32  ;;  %v3633_v31 = vld [vmem:[%s4040_s6 + $0x130] ss:$8 sps:$4 sm:$0xff]  }
  0xb5   : > { %1210 = vmatprep.mubr.bf16.mxu0 %v3539_v33  ;;  %1466 = vmatprep.mubr.bf16.mxu1 %v3541_v34  ;;  %v3634_v32 = vld [vmem:[%s4040_s6 + $0x330] ss:$8 sps:$4 sm:$0xff]   ;;  %v3635_v33 = vld [vmem:[%s4040_s6 + $0x144] ss:$8 sps:$4 sm:$0xff]  }
  0xb6   : > { %v3637_v34 = vld [vmem:[%s4040_s6 + $0x344] ss:$8 sps:$4 sm:$0xff]  }
  0xbc   : > { %1211 = vmatmul.mubr.bf16.gmra.mrb[16].mxu0 %v3543_v35  ;;  %1467 = vmatmul.mubr.bf16.gmra.mrb[16].mxu1 %v3544_v36  ;;  %v3639_v35 = vld [vmem:[%s4040_s6 + $0x140] ss:$8 sps:$4 sm:$0xff]  }
  0xbd   : > { %1218 = vmatprep.mubr.bf16.mxu0 %v3545_v37  ;;  %1474 = vmatprep.mubr.bf16.mxu1 %v3547_v38  ;;  %v3640_v36 = vld [vmem:[%s4040_s6 + $0x340] ss:$8 sps:$4 sm:$0xff]   ;;  %v3641_v37 = vld [vmem:[%s4040_s6 + $0x154] ss:$8 sps:$4 sm:$0xff]  }
  0xbe   : > { %v3643_v38 = vld [vmem:[%s4040_s6 + $0x354] ss:$8 sps:$4 sm:$0xff]  }
  0xc4   : > { %1219 = vmatmul.mubr.bf16.gmra.mrb[20].mxu0 %v3549_v39  ;;  %1475 = vmatmul.mubr.bf16.gmra.mrb[20].mxu1 %v3550_v40  ;;  %v3645_v39 = vld [vmem:[%s4040_s6 + $0x150] ss:$8 sps:$4 sm:$0xff]  }
  0xc5   : > { %1226 = vmatprep.mubr.bf16.mxu0 %v3551_v41  ;;  %1482 = vmatprep.mubr.bf16.mxu1 %v3553_v42  ;;  %v3646_v40 = vld [vmem:[%s4040_s6 + $0x350] ss:$8 sps:$4 sm:$0xff]   ;;  %v3647_v41 = vld [vmem:[%s4040_s6 + $0x164] ss:$8 sps:$4 sm:$0xff]  }
  0xc6   : > { %v3649_v42 = vld [vmem:[%s4040_s6 + $0x364] ss:$8 sps:$4 sm:$0xff]  }
  0xcc   : > { %1227 = vmatmul.mubr.bf16.gmra.mrb[24].mxu0 %v3555_v43  ;;  %1483 = vmatmul.mubr.bf16.gmra.mrb[24].mxu1 %v3556_v44  ;;  %v3651_v43 = vld [vmem:[%s4040_s6 + $0x160] ss:$8 sps:$4 sm:$0xff]  }
  0xcd   : > { %1234 = vmatprep.mubr.bf16.mxu0 %v3557_v45  ;;  %1490 = vmatprep.mubr.bf16.mxu1 %v3559_v46  ;;  %v3652_v44 = vld [vmem:[%s4040_s6 + $0x360] ss:$8 sps:$4 sm:$0xff]   ;;  %v3653_v45 = vld [vmem:[%s4040_s6 + $0x174] ss:$8 sps:$4 sm:$0xff]  }
  0xce   : > { %v3655_v46 = vld [vmem:[%s4040_s6 + $0x374] ss:$8 sps:$4 sm:$0xff]  }
  0xd4   : > { %1235 = vmatmul.mubr.bf16.gmra.mrb[28].mxu0 %v3561_v47  ;;  %1491 = vmatmul.mubr.bf16.gmra.mrb[28].mxu1 %v3562_v48  ;;  %v3657_v47 = vld [vmem:[%s4040_s6 + $0x170] ss:$8 sps:$4 sm:$0xff]  }
  0xd5   : > { %1242 = vmatprep.mubr.bf16.mxu0 %v3563_v49  ;;  %1498 = vmatprep.mubr.bf16.mxu1 %v3565_v50  ;;  %v3658_v48 = vld [vmem:[%s4040_s6 + $0x370] ss:$8 sps:$4 sm:$0xff]   ;;  %v3659_v49 = vld [vmem:[%s4040_s6 + $0x184] ss:$8 sps:$4 sm:$0xff]  }
  0xd6   : > { %v3661_v50 = vld [vmem:[%s4040_s6 + $0x384] ss:$8 sps:$4 sm:$0xff]  }
  0xdc   : > { %1243 = vmatmul.mubr.bf16.gmra.mrb[32].mxu0 %v3567_v51  ;;  %1499 = vmatmul.mubr.bf16.gmra.mrb[32].mxu1 %v3568_v52  ;;  %v3663_v51 = vld [vmem:[%s4040_s6 + $0x180] ss:$8 sps:$4 sm:$0xff]  }
  0xdd   : > { %1250 = vmatprep.mubr.bf16.mxu0 %v3569_v53  ;;  %1506 = vmatprep.mubr.bf16.mxu1 %v3571_v54  ;;  %v3664_v52 = vld [vmem:[%s4040_s6 + $0x380] ss:$8 sps:$4 sm:$0xff]   ;;  %v3665_v53 = vld [vmem:[%s4040_s6 + $0x194] ss:$8 sps:$4 sm:$0xff]  }
  0xde   : > { %v3667_v54 = vld [vmem:[%s4040_s6 + $0x394] ss:$8 sps:$4 sm:$0xff]  }
  0xe4   : > { %1251 = vmatmul.mubr.bf16.gmra.mrb[36].mxu0 %v3573_v55  ;;  %1507 = vmatmul.mubr.bf16.gmra.mrb[36].mxu1 %v3574_v56  ;;  %v3669_v55 = vld [vmem:[%s4040_s6 + $0x190] ss:$8 sps:$4 sm:$0xff]  }
  0xe5   : > { %1258 = vmatprep.mubr.bf16.mxu0 %v3575_v57  ;;  %1514 = vmatprep.mubr.bf16.mxu1 %v3577_v58  ;;  %v3670_v56 = vld [vmem:[%s4040_s6 + $0x390] ss:$8 sps:$4 sm:$0xff]   ;;  %v3671_v57 = vld [vmem:[%s4040_s6 + $0x1a4] ss:$8 sps:$4 sm:$0xff]  }
  0xe6   : > { %v3673_v58 = vld [vmem:[%s4040_s6 + $0x3a4] ss:$8 sps:$4 sm:$0xff]  }
  0xec   : > { %1259 = vmatmul.mubr.bf16.gmra.mrb[40].mxu0 %v3579_v59  ;;  %1515 = vmatmul.mubr.bf16.gmra.mrb[40].mxu1 %v3580_v60  ;;  %v3675_v59 = vld [vmem:[%s4040_s6 + $0x1a0] ss:$8 sps:$4 sm:$0xff]  }
  0xed   : > { %1266 = vmatprep.mubr.bf16.mxu0 %v3581_v61  ;;  %1522 = vmatprep.mubr.bf16.mxu1 %v3583_v62  ;;  %v3676_v60 = vld [vmem:[%s4040_s6 + $0x3a0] ss:$8 sps:$4 sm:$0xff]   ;;  %v3677_v61 = vld [vmem:[%s4040_s6 + $0x1b4] ss:$8 sps:$4 sm:$0xff]  }
  0xee   : > { %v3679_v62 = vld [vmem:[%s4040_s6 + $0x3b4] ss:$8 sps:$4 sm:$0xff]  }
  0xf4   : > { %1267 = vmatmul.mubr.bf16.gmra.mrb[44].mxu0 %v3585_v63  ;;  %1523 = vmatmul.mubr.bf16.gmra.mrb[44].mxu1 %v3586_v0  ;;  %v4195_v63 = vld [vmem:[%s4473_s2] ss:$0 sm:$0xff] }
  0xf5   : > { %1274 = vmatprep.mubr.bf16.mxu0 %v3587_v1  ;;  %1530 = vmatprep.mubr.bf16.mxu1 %v3589_v2 }
  0xfc   : > { %1275 = vmatmul.mubr.bf16.gmra.mrb[48].mxu0 %v3591_v3  ;;  %1531 = vmatmul.mubr.bf16.gmra.mrb[48].mxu1 %v3592_v4 }
  0xfd   : > { %1282 = vmatprep.mubr.bf16.mxu0 %v3593_v5  ;;  %1538 = vmatprep.mubr.bf16.mxu1 %v3595_v6  ;;  %v3681_v6 = vld [vmem:[%s4040_s6 + $0x1b0] ss:$8 sps:$4 sm:$0xff]  }
 0x104   : > { %1283 = vmatmul.mubr.bf16.gmra.mrb[52].mxu0 %v3597_v7  ;;  %1539 = vmatmul.mubr.bf16.gmra.mrb[52].mxu1 %v3598_v8  ;;  %v3682_v7 = vld [vmem:[%s4040_s6 + $0x3b0] ss:$8 sps:$4 sm:$0xff]  }
 0x105   : > { %1290 = vmatprep.mubr.bf16.mxu0 %v3599_v9  ;;  %1546 = vmatprep.mubr.bf16.mxu1 %v3601_v10  ;;  %v3683_v10 = vld [vmem:[%s4040_s6 + $0x1c4] ss:$8 sps:$4 sm:$0xff]  }
 0x10c   : > { %1291 = vmatmul.mubr.bf16.gmra.mrb[56].mxu0 %v3603_v11  ;;  %1547 = vmatmul.mubr.bf16.gmra.mrb[56].mxu1 %v3604_v12  ;;  %v3685_v11 = vld [vmem:[%s4040_s6 + $0x3c4] ss:$8 sps:$4 sm:$0xff]  }
 0x10d   : > { %1298 = vmatprep.mubr.bf16.mxu0 %v3605_v13  ;;  %1554 = vmatprep.mubr.bf16.mxu1 %v3607_v14 }
 0x114   : > { %1299 = vmatmul.mubr.bf16.gmra.mrb[60].mxu0 %v3609_v15  ;;  %1555 = vmatmul.mubr.bf16.gmra.mrb[60].mxu1 %v3610_v16 }
 0x115   : > { %1306 = vmatprep.mubr.bf16.mxu0 %v3611_v17  ;;  %1562 = vmatprep.mubr.bf16.mxu1 %v3613_v18 }
 0x11c   : > { %1307 = vmatmul.mubr.bf16.gmra.mrb[64].mxu0 %v3615_v19  ;;  %1563 = vmatmul.mubr.bf16.gmra.mrb[64].mxu1 %v3616_v20 }
 0x11d   : > { %1314 = vmatprep.mubr.bf16.mxu0 %v3617_v21  ;;  %1570 = vmatprep.mubr.bf16.mxu1 %v3619_v22 }
 0x124   : > { %1315 = vmatmul.mubr.bf16.gmra.mrb[68].mxu0 %v3621_v23  ;;  %1571 = vmatmul.mubr.bf16.gmra.mrb[68].mxu1 %v3622_v24 }
 0x125   : > { %1322 = vmatprep.mubr.bf16.mxu0 %v3623_v25  ;;  %1578 = vmatprep.mubr.bf16.mxu1 %v3625_v26 }
 0x12c   : > { %1323 = vmatmul.mubr.bf16.gmra.mrb[72].mxu0 %v3627_v27  ;;  %1579 = vmatmul.mubr.bf16.gmra.mrb[72].mxu1 %v3628_v28  ;;  %v3687_v28 = vld [vmem:[%s4040_s6 + $0x1c0] ss:$8 sps:$4 sm:$0xff]  }
 0x12d   : > { %1330 = vmatprep.mubr.bf16.mxu0 %v3629_v29  ;;  %1586 = vmatprep.mubr.bf16.mxu1 %v3631_v30  ;;  %v3688_v29 = vld [vmem:[%s4040_s6 + $0x3c0] ss:$8 sps:$4 sm:$0xff]  }
 0x134   : > { %1331 = vmatmul.mubr.bf16.gmra.mrb[76].mxu0 %v3633_v31  ;;  %1587 = vmatmul.mubr.bf16.gmra.mrb[76].mxu1 %v3634_v32  ;;  %v3689_v32 = vld [vmem:[%s4040_s6 + $0x1d4] ss:$8 sps:$4 sm:$0xff]  }
 0x135   : > { %1338 = vmatprep.mubr.bf16.mxu0 %v3635_v33  ;;  %1594 = vmatprep.mubr.bf16.mxu1 %v3637_v34  ;;  %v3691_v33 = vld [vmem:[%s4040_s6 + $0x3d4] ss:$8 sps:$4 sm:$0xff]  }
 0x13c   : > { %1339 = vmatmul.mubr.bf16.gmra.mrb[80].mxu0 %v3639_v35  ;;  %1595 = vmatmul.mubr.bf16.gmra.mrb[80].mxu1 %v3640_v36 }
 0x13d   : > { %1346 = vmatprep.mubr.bf16.mxu0 %v3641_v37  ;;  %1602 = vmatprep.mubr.bf16.mxu1 %v3643_v38 }
 0x144   : > { %1347 = vmatmul.mubr.bf16.gmra.mrb[84].mxu0 %v3645_v39  ;;  %1603 = vmatmul.mubr.bf16.gmra.mrb[84].mxu1 %v3646_v40 }
 0x145   : > { %1354 = vmatprep.mubr.bf16.mxu0 %v3647_v41  ;;  %1610 = vmatprep.mubr.bf16.mxu1 %v3649_v42 }
 0x14c   : > { %1355 = vmatmul.mubr.bf16.gmra.mrb[88].mxu0 %v3651_v43  ;;  %1611 = vmatmul.mubr.bf16.gmra.mrb[88].mxu1 %v3652_v44 }
 0x14d   : > { %1362 = vmatprep.mubr.bf16.mxu0 %v3653_v45  ;;  %1618 = vmatprep.mubr.bf16.mxu1 %v3655_v46 }
 0x154   : > { %1363 = vmatmul.mubr.bf16.gmra.mrb[92].mxu0 %v3657_v47  ;;  %1619 = vmatmul.mubr.bf16.gmra.mrb[92].mxu1 %v3658_v48 }
 0x155   : > { %1370 = vmatprep.mubr.bf16.mxu0 %v3659_v49  ;;  %1626 = vmatprep.mubr.bf16.mxu1 %v3661_v50  ;;  %v3693_v50 = vld [vmem:[%s4040_s6 + $0x1d0] ss:$8 sps:$4 sm:$0xff]  }
 0x15c   : > { %1371 = vmatmul.mubr.bf16.gmra.mrb[96].mxu0 %v3663_v51  ;;  %1627 = vmatmul.mubr.bf16.gmra.mrb[96].mxu1 %v3664_v52  ;;  %v3694_v51 = vld [vmem:[%s4040_s6 + $0x3d0] ss:$8 sps:$4 sm:$0xff]  }
 0x15d   : > { %1378 = vmatprep.mubr.bf16.mxu0 %v3665_v53  ;;  %1634 = vmatprep.mubr.bf16.mxu1 %v3667_v54  ;;  %v3695_v54 = vld [vmem:[%s4040_s6 + $0x1e4] ss:$8 sps:$4 sm:$0xff]  }
 0x164   : > { %1379 = vmatmul.mubr.bf16.gmra.mrb[100].mxu0 %v3669_v55  ;;  %1635 = vmatmul.mubr.bf16.gmra.mrb[100].mxu1 %v3670_v56  ;;  %v3697_v55 = vld [vmem:[%s4040_s6 + $0x3e4] ss:$8 sps:$4 sm:$0xff]  }
 0x165   : > { %1386 = vmatprep.mubr.bf16.mxu0 %v3671_v57  ;;  %1642 = vmatprep.mubr.bf16.mxu1 %v3673_v58 }
 0x16c   : > { %1387 = vmatmul.mubr.bf16.gmra.mrb[104].mxu0 %v3675_v59  ;;  %1643 = vmatmul.mubr.bf16.gmra.mrb[104].mxu1 %v3676_v60 }
 0x16d   : > { %1394 = vmatprep.mubr.bf16.mxu0 %v3677_v61  ;;  %1650 = vmatprep.mubr.bf16.mxu1 %v3679_v62 }
 0x16f   : > { %v1180_v0 = vpop.f32.mrb[0].mxu0  ;;  %v1436_v1 = vpop.f32.mrb[0].mxu1 }
 0x170   : > { %v1181_v2 = vadd.f32 %v4195_v63, %v1180_v0  ;;  %v1437_v3 = vadd.f32 %v4195_v63, %v1436_v1  ;;  %v1182_v4 = vpop.f32.mrb[1].mxu0  ;;  %v1438_v5 = vpop.f32.mrb[1].mxu1 }
 0x171   : > { %v1183_v8 = vpop.f32.mrb[2].mxu0  ;;  %v1439_v9 = vpop.f32.mrb[2].mxu1 }
 0x172   : > { %v1184_v12 = vadd.f32 %v4195_v63, %v1183_v8  ;;  %v1440_v13 = vadd.f32 %v4195_v63, %v1439_v9  ;;  %v1185_v14 = vpop.f32.mrb[3].mxu0  ;;  %v1441_v15 = vpop.f32.mrb[3].mxu1  ;;  %v1691_v16 = vmax.f32 %v1181_v2, 0.0  ;;  %v1755_v17 = vmax.f32 %v1437_v3, 0.0  ;;  %v3699_v9 = vld [vmem:[%s4040_s6 + $0x1e0] ss:$8 sps:$4 sm:$0xff]  }
 0x173   : > { %v3703_v14 = vld [vmem:[%s4040_s6 + $0x3f4] ss:$8 sps:$4 sm:$0xff]  }
 0x174   : > { %v1692_v18 = vmax.f32 %v1184_v12, 0.0  ;;  %v1756_v19 = vmax.f32 %v1440_v13, 0.0  ;;  %1395 = vmatmul.mubr.bf16.gmra.mrb[108].mxu0 %v3681_v6  ;;  %1651 = vmatmul.mubr.bf16.gmra.mrb[108].mxu1 %v3682_v7  ;;  %v3701_v13 = vld [vmem:[%s4040_s6 + $0x1f4] ss:$8 sps:$4 sm:$0xff]  }
 0x175   : > { %1402 = vmatprep.mubr.bf16.mxu0 %v3683_v10  ;;  %1658 = vmatprep.mubr.bf16.mxu1 %v3685_v11  ;;  %v3700_v10 = vld [vmem:[%s4040_s6 + $0x3e0] ss:$8 sps:$4 sm:$0xff]  }
 0x176   : > { %v3007_v20 = vpack.c.bf16 %v1692_v18, %v1691_v16  ;;  %v3167_v21 = vpack.c.bf16 %v1756_v19, %v1755_v17 }
 0x177   : > { %v1188_v22 = vpop.f32.mrb[4].mxu0  ;;  %v1444_v23 = vpop.f32.mrb[4].mxu1 }
 0x178   : > { %3008 = vst [vmem:[%s4206_s9] sm:$0xff] %v3007_v20   ;;  %3355 = vst [vmem:[%s4206_s9 + $0x100] sm:$0xff] %v3167_v21   ;;  %v1189_v24 = vadd.f32 %v4195_v63, %v1188_v22  ;;  %v1445_v25 = vadd.f32 %v4195_v63, %v1444_v23  ;;  %v1190_v26 = vpop.f32.mrb[5].mxu0  ;;  %v1446_v27 = vpop.f32.mrb[5].mxu1 }
 0x179   : > { %v1191_v30 = vpop.f32.mrb[6].mxu0  ;;  %v1447_v31 = vpop.f32.mrb[6].mxu1 }
 0x17a   : > { %v1192_v34 = vadd.f32 %v4195_v63, %v1191_v30  ;;  %v1448_v35 = vadd.f32 %v4195_v63, %v1447_v31  ;;  %v1193_v36 = vpop.f32.mrb[7].mxu0  ;;  %v1449_v37 = vpop.f32.mrb[7].mxu1  ;;  %v1693_v38 = vmax.f32 %v1189_v24, 0.0  ;;  %v1757_v39 = vmax.f32 %v1445_v25, 0.0  ;;  %v3705_v31 = vld [vmem:[%s4040_s6 + $0x1f0] ss:$8 sps:$4 sm:$0xff]  }
 0x17c   : > { %v1694_v40 = vmax.f32 %v1192_v34, 0.0  ;;  %v1758_v41 = vmax.f32 %v1448_v35, 0.0  ;;  %1403 = vmatmul.mubr.bf16.gmra.mrb[112].mxu0 %v3687_v28  ;;  %1659 = vmatmul.mubr.bf16.gmra.mrb[112].mxu1 %v3688_v29 }
 0x17d   : > { %1410 = vmatprep.mubr.bf16.mxu0 %v3689_v32  ;;  %1666 = vmatprep.mubr.bf16.mxu1 %v3691_v33  ;;  %v3706_v32 = vld [vmem:[%s4040_s6 + $0x3f0] ss:$8 sps:$4 sm:$0xff]  }
 0x17e   : > { %v3012_v42 = vpack.c.bf16 %v1694_v40, %v1693_v38  ;;  %v3172_v43 = vpack.c.bf16 %v1758_v41, %v1757_v39 }
 0x17f   : > { %v1196_v44 = vpop.f32.mrb[8].mxu0  ;;  %v1452_v45 = vpop.f32.mrb[8].mxu1 }
 0x180   : > { %3324 = vst [vmem:[%s4206_s9 + $0x8] sm:$0xff] %v3012_v42   ;;  %3356 = vst [vmem:[%s4206_s9 + $0x108] sm:$0xff] %v3172_v43   ;;  %v1197_v46 = vadd.f32 %v4195_v63, %v1196_v44  ;;  %v1453_v47 = vadd.f32 %v4195_v63, %v1452_v45  ;;  %v1198_v48 = vpop.f32.mrb[9].mxu0  ;;  %v1454_v49 = vpop.f32.mrb[9].mxu1 }
 0x181   : > { %v1199_v52 = vpop.f32.mrb[10].mxu0  ;;  %v1455_v53 = vpop.f32.mrb[10].mxu1 }
 0x182   : > { %v1200_v56 = vadd.f32 %v4195_v63, %v1199_v52  ;;  %v1456_v57 = vadd.f32 %v4195_v63, %v1455_v53  ;;  %v1201_v58 = vpop.f32.mrb[11].mxu0  ;;  %v1457_v59 = vpop.f32.mrb[11].mxu1  ;;  %v1695_v60 = vmax.f32 %v1197_v46, 0.0  ;;  %v1759_v61 = vmax.f32 %v1453_v47, 0.0 }
 0x184   : > { %v1696_v62 = vmax.f32 %v1200_v56, 0.0  ;;  %v1760_v0 = vmax.f32 %v1456_v57, 0.0  ;;  %1411 = vmatmul.mubr.bf16.gmra.mrb[116].mxu0 %v3693_v50  ;;  %1667 = vmatmul.mubr.bf16.gmra.mrb[116].mxu1 %v3694_v51 }
 0x185   : > { %1418 = vmatprep.mubr.bf16.mxu0 %v3695_v54  ;;  %1674 = vmatprep.mubr.bf16.mxu1 %v3697_v55 }
 0x186   : > { %v3017_v1 = vpack.c.bf16 %v1696_v62, %v1695_v60  ;;  %v3177_v2 = vpack.c.bf16 %v1760_v0, %v1759_v61 }
 0x187   : > { %v1204_v3 = vpop.f32.mrb[12].mxu0  ;;  %v1460_v4 = vpop.f32.mrb[12].mxu1 }
 0x188   : > { %3325 = vst [vmem:[%s4206_s9 + $0x10] sm:$0xff] %v3017_v1   ;;  %3357 = vst [vmem:[%s4206_s9 + $0x110] sm:$0xff] %v3177_v2   ;;  %v1205_v5 = vadd.f32 %v4195_v63, %v1204_v3  ;;  %v1461_v6 = vadd.f32 %v4195_v63, %v1460_v4  ;;  %v1206_v7 = vpop.f32.mrb[13].mxu0  ;;  %v1462_v8 = vpop.f32.mrb[13].mxu1 }
 0x189   : > { %v1207_v11 = vpop.f32.mrb[14].mxu0  ;;  %v1463_v12 = vpop.f32.mrb[14].mxu1 }
 0x18a   : > { %v1208_v15 = vadd.f32 %v4195_v63, %v1207_v11  ;;  %v1464_v16 = vadd.f32 %v4195_v63, %v1463_v12  ;;  %v1209_v17 = vpop.f32.mrb[15].mxu0  ;;  %v1465_v18 = vpop.f32.mrb[15].mxu1  ;;  %v1697_v19 = vmax.f32 %v1205_v5, 0.0  ;;  %v1761_v20 = vmax.f32 %v1461_v6, 0.0 }
 0x18c   : > { %v1698_v21 = vmax.f32 %v1208_v15, 0.0  ;;  %v1762_v22 = vmax.f32 %v1464_v16, 0.0  ;;  %1419 = vmatmul.mubr.bf16.gmra.mrb[120].mxu0 %v3699_v9  ;;  %1675 = vmatmul.mubr.bf16.gmra.mrb[120].mxu1 %v3700_v10 }
 0x18d   : > { %1426 = vmatprep.mubr.bf16.mxu0 %v3701_v13  ;;  %1682 = vmatprep.mubr.bf16.mxu1 %v3703_v14 }
 0x18e   : > { %v3022_v23 = vpack.c.bf16 %v1698_v21, %v1697_v19  ;;  %v3182_v24 = vpack.c.bf16 %v1762_v22, %v1761_v20 }
 0x18f   : > { %v1212_v25 = vpop.f32.mrb[16].mxu0  ;;  %v1468_v26 = vpop.f32.mrb[16].mxu1 }
 0x190   : > { %3326 = vst [vmem:[%s4206_s9 + $0x18] sm:$0xff] %v3022_v23   ;;  %3358 = vst [vmem:[%s4206_s9 + $0x118] sm:$0xff] %v3182_v24   ;;  %v1213_v27 = vadd.f32 %v4195_v63, %v1212_v25  ;;  %v1469_v28 = vadd.f32 %v4195_v63, %v1468_v26  ;;  %v1214_v29 = vpop.f32.mrb[17].mxu0  ;;  %v1470_v30 = vpop.f32.mrb[17].mxu1 }
 0x191   : > { %v1215_v33 = vpop.f32.mrb[18].mxu0  ;;  %v1471_v34 = vpop.f32.mrb[18].mxu1 }
 0x192   : > { %v1216_v35 = vadd.f32 %v4195_v63, %v1215_v33  ;;  %v1472_v36 = vadd.f32 %v4195_v63, %v1471_v34  ;;  %v1217_v37 = vpop.f32.mrb[19].mxu0  ;;  %v1473_v38 = vpop.f32.mrb[19].mxu1  ;;  %v1699_v39 = vmax.f32 %v1213_v27, 0.0  ;;  %v1763_v40 = vmax.f32 %v1469_v28, 0.0 }
 0x194   : > { %v1700_v41 = vmax.f32 %v1216_v35, 0.0  ;;  %v1764_v42 = vmax.f32 %v1472_v36, 0.0  ;;  %1427 = vmatmul.mubr.bf16.gmra.mrb[124].mxu0 %v3705_v31  ;;  %1683 = vmatmul.mubr.bf16.gmra.mrb[124].mxu1 %v3706_v32 }
 0x196   : > { %v3027_v43 = vpack.c.bf16 %v1700_v41, %v1699_v39  ;;  %v3187_v44 = vpack.c.bf16 %v1764_v42, %v1763_v40 }
 0x197   : > { %v1220_v45 = vpop.f32.mrb[20].mxu0  ;;  %v1476_v46 = vpop.f32.mrb[20].mxu1 }
 0x198   : > { %3327 = vst [vmem:[%s4206_s9 + $0x20] sm:$0xff] %v3027_v43   ;;  %3359 = vst [vmem:[%s4206_s9 + $0x120] sm:$0xff] %v3187_v44   ;;  %v1221_v47 = vadd.f32 %v4195_v63, %v1220_v45  ;;  %v1477_v48 = vadd.f32 %v4195_v63, %v1476_v46  ;;  %v1222_v49 = vpop.f32.mrb[21].mxu0  ;;  %v1478_v50 = vpop.f32.mrb[21].mxu1 }
 0x199   : > { %v1223_v51 = vpop.f32.mrb[22].mxu0  ;;  %v1479_v52 = vpop.f32.mrb[22].mxu1 }
 0x19a   : > { %v1224_v53 = vadd.f32 %v4195_v63, %v1223_v51  ;;  %v1480_v54 = vadd.f32 %v4195_v63, %v1479_v52  ;;  %v1225_v55 = vpop.f32.mrb[23].mxu0  ;;  %v1481_v56 = vpop.f32.mrb[23].mxu1  ;;  %v1701_v57 = vmax.f32 %v1221_v47, 0.0  ;;  %v1765_v58 = vmax.f32 %v1477_v48, 0.0 }
 0x19c   : > { %v1702_v59 = vmax.f32 %v1224_v53, 0.0  ;;  %v1766_v60 = vmax.f32 %v1480_v54, 0.0 }
 0x19e   : > { %v3032_v61 = vpack.c.bf16 %v1702_v59, %v1701_v57  ;;  %v3192_v62 = vpack.c.bf16 %v1766_v60, %v1765_v58 }
 0x19f   : > { %v1228_v0 = vpop.f32.mrb[24].mxu0  ;;  %v1484_v1 = vpop.f32.mrb[24].mxu1 }
 0x1a0   : > { %3328 = vst [vmem:[%s4206_s9 + $0x28] sm:$0xff] %v3032_v61   ;;  %3360 = vst [vmem:[%s4206_s9 + $0x128] sm:$0xff] %v3192_v62   ;;  %v1229_v2 = vadd.f32 %v4195_v63, %v1228_v0  ;;  %v1485_v3 = vadd.f32 %v4195_v63, %v1484_v1  ;;  %v1230_v4 = vpop.f32.mrb[25].mxu0  ;;  %v1486_v5 = vpop.f32.mrb[25].mxu1 }
 0x1a1   : > { %v1231_v6 = vpop.f32.mrb[26].mxu0  ;;  %v1487_v7 = vpop.f32.mrb[26].mxu1 }
 0x1a2   : > { %v1232_v8 = vadd.f32 %v4195_v63, %v1231_v6  ;;  %v1488_v9 = vadd.f32 %v4195_v63, %v1487_v7  ;;  %v1233_v10 = vpop.f32.mrb[27].mxu0  ;;  %v1489_v11 = vpop.f32.mrb[27].mxu1  ;;  %v1703_v12 = vmax.f32 %v1229_v2, 0.0  ;;  %v1767_v13 = vmax.f32 %v1485_v3, 0.0 }
 0x1a4   : > { %v1704_v14 = vmax.f32 %v1232_v8, 0.0  ;;  %v1768_v15 = vmax.f32 %v1488_v9, 0.0 }
 0x1a6   : > { %v3037_v16 = vpack.c.bf16 %v1704_v14, %v1703_v12  ;;  %v3197_v17 = vpack.c.bf16 %v1768_v15, %v1767_v13 }
 0x1a7   : > { %v1236_v18 = vpop.f32.mrb[28].mxu0  ;;  %v1492_v19 = vpop.f32.mrb[28].mxu1 }
 0x1a8   : > { %3329 = vst [vmem:[%s4206_s9 + $0x30] sm:$0xff] %v3037_v16   ;;  %3361 = vst [vmem:[%s4206_s9 + $0x130] sm:$0xff] %v3197_v17   ;;  %v1237_v20 = vadd.f32 %v4195_v63, %v1236_v18  ;;  %v1493_v21 = vadd.f32 %v4195_v63, %v1492_v19  ;;  %v1238_v22 = vpop.f32.mrb[29].mxu0  ;;  %v1494_v23 = vpop.f32.mrb[29].mxu1 }
 0x1a9   : > { %v1239_v24 = vpop.f32.mrb[30].mxu0  ;;  %v1495_v25 = vpop.f32.mrb[30].mxu1 }
 0x1aa   : > { %v1240_v26 = vadd.f32 %v4195_v63, %v1239_v24  ;;  %v1496_v27 = vadd.f32 %v4195_v63, %v1495_v25  ;;  %v1241_v28 = vpop.f32.mrb[31].mxu0  ;;  %v1497_v29 = vpop.f32.mrb[31].mxu1  ;;  %v1705_v30 = vmax.f32 %v1237_v20, 0.0  ;;  %v1769_v31 = vmax.f32 %v1493_v21, 0.0 }
 0x1ac   : > { %v1706_v32 = vmax.f32 %v1240_v26, 0.0  ;;  %v1770_v33 = vmax.f32 %v1496_v27, 0.0 }
 0x1ae   : > { %v3042_v34 = vpack.c.bf16 %v1706_v32, %v1705_v30  ;;  %v3202_v35 = vpack.c.bf16 %v1770_v33, %v1769_v31 }
 0x1af   : > { %v1244_v36 = vpop.f32.mrb[32].mxu0  ;;  %v1500_v37 = vpop.f32.mrb[32].mxu1 }
 0x1b0   : > { %3330 = vst [vmem:[%s4206_s9 + $0x38] sm:$0xff] %v3042_v34   ;;  %3362 = vst [vmem:[%s4206_s9 + $0x138] sm:$0xff] %v3202_v35   ;;  %v1245_v38 = vadd.f32 %v4195_v63, %v1244_v36  ;;  %v1501_v39 = vadd.f32 %v4195_v63, %v1500_v37  ;;  %v1246_v40 = vpop.f32.mrb[33].mxu0  ;;  %v1502_v41 = vpop.f32.mrb[33].mxu1 }
 0x1b1   : > { %v1247_v42 = vpop.f32.mrb[34].mxu0  ;;  %v1503_v43 = vpop.f32.mrb[34].mxu1 }
 0x1b2   : > { %v1248_v44 = vadd.f32 %v4195_v63, %v1247_v42  ;;  %v1504_v45 = vadd.f32 %v4195_v63, %v1503_v43  ;;  %v1249_v46 = vpop.f32.mrb[35].mxu0  ;;  %v1505_v47 = vpop.f32.mrb[35].mxu1  ;;  %v1707_v48 = vmax.f32 %v1245_v38, 0.0  ;;  %v1771_v49 = vmax.f32 %v1501_v39, 0.0 }
 0x1b4   : > { %v1708_v50 = vmax.f32 %v1248_v44, 0.0  ;;  %v1772_v51 = vmax.f32 %v1504_v45, 0.0 }
 0x1b6   : > { %v3047_v52 = vpack.c.bf16 %v1708_v50, %v1707_v48  ;;  %v3207_v53 = vpack.c.bf16 %v1772_v51, %v1771_v49 }
 0x1b7   : > { %v1252_v54 = vpop.f32.mrb[36].mxu0  ;;  %v1508_v55 = vpop.f32.mrb[36].mxu1 }
 0x1b8   : > { %3331 = vst [vmem:[%s4206_s9 + $0x40] sm:$0xff] %v3047_v52   ;;  %3363 = vst [vmem:[%s4206_s9 + $0x140] sm:$0xff] %v3207_v53   ;;  %v1253_v56 = vadd.f32 %v4195_v63, %v1252_v54  ;;  %v1509_v57 = vadd.f32 %v4195_v63, %v1508_v55  ;;  %v1254_v58 = vpop.f32.mrb[37].mxu0  ;;  %v1510_v59 = vpop.f32.mrb[37].mxu1 }
 0x1b9   : > { %v1255_v60 = vpop.f32.mrb[38].mxu0  ;;  %v1511_v61 = vpop.f32.mrb[38].mxu1 }
 0x1ba   : > { %v1256_v62 = vadd.f32 %v4195_v63, %v1255_v60  ;;  %v1512_v0 = vadd.f32 %v4195_v63, %v1511_v61  ;;  %v1257_v1 = vpop.f32.mrb[39].mxu0  ;;  %v1513_v2 = vpop.f32.mrb[39].mxu1  ;;  %v1709_v3 = vmax.f32 %v1253_v56, 0.0  ;;  %v1773_v4 = vmax.f32 %v1509_v57, 0.0 }
 0x1bc   : > { %v1710_v5 = vmax.f32 %v1256_v62, 0.0  ;;  %v1774_v6 = vmax.f32 %v1512_v0, 0.0 }
 0x1be   : > { %v3052_v7 = vpack.c.bf16 %v1710_v5, %v1709_v3  ;;  %v3212_v8 = vpack.c.bf16 %v1774_v6, %v1773_v4 }
 0x1bf   : > { %v1260_v9 = vpop.f32.mrb[40].mxu0  ;;  %v1516_v10 = vpop.f32.mrb[40].mxu1 }
 0x1c0   : > { %3332 = vst [vmem:[%s4206_s9 + $0x48] sm:$0xff] %v3052_v7   ;;  %3364 = vst [vmem:[%s4206_s9 + $0x148] sm:$0xff] %v3212_v8   ;;  %v1261_v11 = vadd.f32 %v4195_v63, %v1260_v9  ;;  %v1517_v12 = vadd.f32 %v4195_v63, %v1516_v10  ;;  %v1262_v13 = vpop.f32.mrb[41].mxu0  ;;  %v1518_v14 = vpop.f32.mrb[41].mxu1 }
 0x1c1   : > { %v1263_v15 = vpop.f32.mrb[42].mxu0  ;;  %v1519_v16 = vpop.f32.mrb[42].mxu1 }
 0x1c2   : > { %v1264_v17 = vadd.f32 %v4195_v63, %v1263_v15  ;;  %v1520_v18 = vadd.f32 %v4195_v63, %v1519_v16  ;;  %v1265_v19 = vpop.f32.mrb[43].mxu0  ;;  %v1521_v20 = vpop.f32.mrb[43].mxu1  ;;  %v1711_v21 = vmax.f32 %v1261_v11, 0.0  ;;  %v1775_v22 = vmax.f32 %v1517_v12, 0.0 }
 0x1c4   : > { %v1712_v23 = vmax.f32 %v1264_v17, 0.0  ;;  %v1776_v24 = vmax.f32 %v1520_v18, 0.0 }
 0x1c6   : > { %v3057_v25 = vpack.c.bf16 %v1712_v23, %v1711_v21  ;;  %v3217_v26 = vpack.c.bf16 %v1776_v24, %v1775_v22 }
 0x1c7   : > { %v1268_v27 = vpop.f32.mrb[44].mxu0  ;;  %v1524_v28 = vpop.f32.mrb[44].mxu1 }
 0x1c8   : > { %3333 = vst [vmem:[%s4206_s9 + $0x50] sm:$0xff] %v3057_v25   ;;  %3365 = vst [vmem:[%s4206_s9 + $0x150] sm:$0xff] %v3217_v26   ;;  %v1269_v29 = vadd.f32 %v4195_v63, %v1268_v27  ;;  %v1525_v30 = vadd.f32 %v4195_v63, %v1524_v28  ;;  %v1270_v31 = vpop.f32.mrb[45].mxu0  ;;  %v1526_v32 = vpop.f32.mrb[45].mxu1 }
 0x1c9   : > { %v1271_v33 = vpop.f32.mrb[46].mxu0  ;;  %v1527_v34 = vpop.f32.mrb[46].mxu1 }
 0x1ca   : > { %v1272_v35 = vadd.f32 %v4195_v63, %v1271_v33  ;;  %v1528_v36 = vadd.f32 %v4195_v63, %v1527_v34  ;;  %v1273_v37 = vpop.f32.mrb[47].mxu0  ;;  %v1529_v38 = vpop.f32.mrb[47].mxu1  ;;  %v1713_v39 = vmax.f32 %v1269_v29, 0.0  ;;  %v1777_v40 = vmax.f32 %v1525_v30, 0.0 }
 0x1cc   : > { %v1714_v41 = vmax.f32 %v1272_v35, 0.0  ;;  %v1778_v42 = vmax.f32 %v1528_v36, 0.0 }
 0x1ce   : > { %v3062_v43 = vpack.c.bf16 %v1714_v41, %v1713_v39  ;;  %v3222_v44 = vpack.c.bf16 %v1778_v42, %v1777_v40 }
 0x1cf   : > { %v1276_v45 = vpop.f32.mrb[48].mxu0  ;;  %v1532_v46 = vpop.f32.mrb[48].mxu1 }
 0x1d0   : > { %3334 = vst [vmem:[%s4206_s9 + $0x58] sm:$0xff] %v3062_v43   ;;  %3366 = vst [vmem:[%s4206_s9 + $0x158] sm:$0xff] %v3222_v44   ;;  %v1277_v47 = vadd.f32 %v4195_v63, %v1276_v45  ;;  %v1533_v48 = vadd.f32 %v4195_v63, %v1532_v46  ;;  %v1278_v49 = vpop.f32.mrb[49].mxu0  ;;  %v1534_v50 = vpop.f32.mrb[49].mxu1 }
 0x1d1   : > { %v1279_v51 = vpop.f32.mrb[50].mxu0  ;;  %v1535_v52 = vpop.f32.mrb[50].mxu1 }
 0x1d2   : > { %v1280_v53 = vadd.f32 %v4195_v63, %v1279_v51  ;;  %v1536_v54 = vadd.f32 %v4195_v63, %v1535_v52  ;;  %v1281_v55 = vpop.f32.mrb[51].mxu0  ;;  %v1537_v56 = vpop.f32.mrb[51].mxu1  ;;  %v1715_v57 = vmax.f32 %v1277_v47, 0.0  ;;  %v1779_v58 = vmax.f32 %v1533_v48, 0.0 }
 0x1d4   : > { %v1716_v59 = vmax.f32 %v1280_v53, 0.0  ;;  %v1780_v60 = vmax.f32 %v1536_v54, 0.0 }
 0x1d6   : > { %v3067_v61 = vpack.c.bf16 %v1716_v59, %v1715_v57  ;;  %v3227_v62 = vpack.c.bf16 %v1780_v60, %v1779_v58 }
 0x1d7   : > { %v1284_v0 = vpop.f32.mrb[52].mxu0  ;;  %v1540_v1 = vpop.f32.mrb[52].mxu1 }
 0x1d8   : > { %3335 = vst [vmem:[%s4206_s9 + $0x60] sm:$0xff] %v3067_v61   ;;  %3367 = vst [vmem:[%s4206_s9 + $0x160] sm:$0xff] %v3227_v62   ;;  %v1285_v2 = vadd.f32 %v4195_v63, %v1284_v0  ;;  %v1541_v3 = vadd.f32 %v4195_v63, %v1540_v1  ;;  %v1286_v4 = vpop.f32.mrb[53].mxu0  ;;  %v1542_v5 = vpop.f32.mrb[53].mxu1 }
 0x1d9   : > { %v1287_v6 = vpop.f32.mrb[54].mxu0  ;;  %v1543_v7 = vpop.f32.mrb[54].mxu1 }
 0x1da   : > { %v1288_v8 = vadd.f32 %v4195_v63, %v1287_v6  ;;  %v1544_v9 = vadd.f32 %v4195_v63, %v1543_v7  ;;  %v1289_v10 = vpop.f32.mrb[55].mxu0  ;;  %v1545_v11 = vpop.f32.mrb[55].mxu1  ;;  %v1717_v12 = vmax.f32 %v1285_v2, 0.0  ;;  %v1781_v13 = vmax.f32 %v1541_v3, 0.0 }
 0x1dc   : > { %v1718_v14 = vmax.f32 %v1288_v8, 0.0  ;;  %v1782_v15 = vmax.f32 %v1544_v9, 0.0 }
 0x1de   : > { %v3072_v16 = vpack.c.bf16 %v1718_v14, %v1717_v12  ;;  %v3232_v17 = vpack.c.bf16 %v1782_v15, %v1781_v13 }
 0x1df   : > { %v1292_v18 = vpop.f32.mrb[56].mxu0  ;;  %v1548_v19 = vpop.f32.mrb[56].mxu1 }
 0x1e0   : > { %3336 = vst [vmem:[%s4206_s9 + $0x68] sm:$0xff] %v3072_v16   ;;  %3368 = vst [vmem:[%s4206_s9 + $0x168] sm:$0xff] %v3232_v17   ;;  %v1293_v20 = vadd.f32 %v4195_v63, %v1292_v18  ;;  %v1549_v21 = vadd.f32 %v4195_v63, %v1548_v19  ;;  %v1294_v22 = vpop.f32.mrb[57].mxu0  ;;  %v1550_v23 = vpop.f32.mrb[57].mxu1 }
 0x1e1   : > { %v1295_v24 = vpop.f32.mrb[58].mxu0  ;;  %v1551_v25 = vpop.f32.mrb[58].mxu1 }
 0x1e2   : > { %v1296_v26 = vadd.f32 %v4195_v63, %v1295_v24  ;;  %v1552_v27 = vadd.f32 %v4195_v63, %v1551_v25  ;;  %v1297_v28 = vpop.f32.mrb[59].mxu0  ;;  %v1553_v29 = vpop.f32.mrb[59].mxu1  ;;  %v1719_v30 = vmax.f32 %v1293_v20, 0.0  ;;  %v1783_v31 = vmax.f32 %v1549_v21, 0.0 }
 0x1e4   : > { %v1720_v32 = vmax.f32 %v1296_v26, 0.0  ;;  %v1784_v33 = vmax.f32 %v1552_v27, 0.0 }
 0x1e6   : > { %v3077_v34 = vpack.c.bf16 %v1720_v32, %v1719_v30  ;;  %v3237_v35 = vpack.c.bf16 %v1784_v33, %v1783_v31 }
 0x1e7   : > { %v1300_v36 = vpop.f32.mrb[60].mxu0  ;;  %v1556_v37 = vpop.f32.mrb[60].mxu1 }
 0x1e8   : > { %3337 = vst [vmem:[%s4206_s9 + $0x70] sm:$0xff] %v3077_v34   ;;  %3369 = vst [vmem:[%s4206_s9 + $0x170] sm:$0xff] %v3237_v35   ;;  %v1301_v38 = vadd.f32 %v4195_v63, %v1300_v36  ;;  %v1557_v39 = vadd.f32 %v4195_v63, %v1556_v37  ;;  %v1302_v40 = vpop.f32.mrb[61].mxu0  ;;  %v1558_v41 = vpop.f32.mrb[61].mxu1 }
 0x1e9   : > { %v1303_v42 = vpop.f32.mrb[62].mxu0  ;;  %v1559_v43 = vpop.f32.mrb[62].mxu1 }
 0x1ea   : > { %v1304_v44 = vadd.f32 %v4195_v63, %v1303_v42  ;;  %v1560_v45 = vadd.f32 %v4195_v63, %v1559_v43  ;;  %v1305_v46 = vpop.f32.mrb[63].mxu0  ;;  %v1561_v47 = vpop.f32.mrb[63].mxu1  ;;  %v1721_v48 = vmax.f32 %v1301_v38, 0.0  ;;  %v1785_v49 = vmax.f32 %v1557_v39, 0.0 }
 0x1ec   : > { %v1722_v50 = vmax.f32 %v1304_v44, 0.0  ;;  %v1786_v51 = vmax.f32 %v1560_v45, 0.0 }
 0x1ee   : > { %v3082_v52 = vpack.c.bf16 %v1722_v50, %v1721_v48  ;;  %v3242_v53 = vpack.c.bf16 %v1786_v51, %v1785_v49 }
 0x1ef   : > { %v1308_v54 = vpop.f32.mrb[64].mxu0  ;;  %v1564_v55 = vpop.f32.mrb[64].mxu1 }
 0x1f0   : > { %3338 = vst [vmem:[%s4206_s9 + $0x78] sm:$0xff] %v3082_v52   ;;  %3370 = vst [vmem:[%s4206_s9 + $0x178] sm:$0xff] %v3242_v53   ;;  %v1309_v56 = vadd.f32 %v4195_v63, %v1308_v54  ;;  %v1565_v57 = vadd.f32 %v4195_v63, %v1564_v55  ;;  %v1310_v58 = vpop.f32.mrb[65].mxu0  ;;  %v1566_v59 = vpop.f32.mrb[65].mxu1 }
 0x1f1   : > { %v1311_v60 = vpop.f32.mrb[66].mxu0  ;;  %v1567_v61 = vpop.f32.mrb[66].mxu1 }
 0x1f2   : > { %v1312_v62 = vadd.f32 %v4195_v63, %v1311_v60  ;;  %v1568_v0 = vadd.f32 %v4195_v63, %v1567_v61  ;;  %v1313_v1 = vpop.f32.mrb[67].mxu0  ;;  %v1569_v2 = vpop.f32.mrb[67].mxu1  ;;  %v1723_v3 = vmax.f32 %v1309_v56, 0.0  ;;  %v1787_v4 = vmax.f32 %v1565_v57, 0.0 }
 0x1f4   : > { %v1724_v5 = vmax.f32 %v1312_v62, 0.0  ;;  %v1788_v6 = vmax.f32 %v1568_v0, 0.0 }
 0x1f6   : > { %v3087_v7 = vpack.c.bf16 %v1724_v5, %v1723_v3  ;;  %v3247_v8 = vpack.c.bf16 %v1788_v6, %v1787_v4 }
 0x1f7   : > { %v1316_v9 = vpop.f32.mrb[68].mxu0  ;;  %v1572_v10 = vpop.f32.mrb[68].mxu1 }
 0x1f8   : > { %3339 = vst [vmem:[%s4206_s9 + $0x80] sm:$0xff] %v3087_v7   ;;  %3371 = vst [vmem:[%s4206_s9 + $0x180] sm:$0xff] %v3247_v8   ;;  %v1317_v11 = vadd.f32 %v4195_v63, %v1316_v9  ;;  %v1573_v12 = vadd.f32 %v4195_v63, %v1572_v10  ;;  %v1318_v13 = vpop.f32.mrb[69].mxu0  ;;  %v1574_v14 = vpop.f32.mrb[69].mxu1 }
 0x1f9   : > { %v1319_v15 = vpop.f32.mrb[70].mxu0  ;;  %v1575_v16 = vpop.f32.mrb[70].mxu1 }
 0x1fa   : > { %v1320_v17 = vadd.f32 %v4195_v63, %v1319_v15  ;;  %v1576_v18 = vadd.f32 %v4195_v63, %v1575_v16  ;;  %v1321_v19 = vpop.f32.mrb[71].mxu0  ;;  %v1577_v20 = vpop.f32.mrb[71].mxu1  ;;  %v1725_v21 = vmax.f32 %v1317_v11, 0.0  ;;  %v1789_v22 = vmax.f32 %v1573_v12, 0.0 }
 0x1fc   : > { %v1726_v23 = vmax.f32 %v1320_v17, 0.0  ;;  %v1790_v24 = vmax.f32 %v1576_v18, 0.0 }
 0x1fe   : > { %v3092_v25 = vpack.c.bf16 %v1726_v23, %v1725_v21  ;;  %v3252_v26 = vpack.c.bf16 %v1790_v24, %v1789_v22 }
 0x1ff   : > { %v1324_v27 = vpop.f32.mrb[72].mxu0  ;;  %v1580_v28 = vpop.f32.mrb[72].mxu1 }
 0x200   : > { %3340 = vst [vmem:[%s4206_s9 + $0x88] sm:$0xff] %v3092_v25   ;;  %3372 = vst [vmem:[%s4206_s9 + $0x188] sm:$0xff] %v3252_v26   ;;  %v1325_v29 = vadd.f32 %v4195_v63, %v1324_v27  ;;  %v1581_v30 = vadd.f32 %v4195_v63, %v1580_v28  ;;  %v1326_v31 = vpop.f32.mrb[73].mxu0  ;;  %v1582_v32 = vpop.f32.mrb[73].mxu1 }
 0x201   : > { %v1327_v33 = vpop.f32.mrb[74].mxu0  ;;  %v1583_v34 = vpop.f32.mrb[74].mxu1 }
 0x202   : > { %v1328_v35 = vadd.f32 %v4195_v63, %v1327_v33  ;;  %v1584_v36 = vadd.f32 %v4195_v63, %v1583_v34  ;;  %v1329_v37 = vpop.f32.mrb[75].mxu0  ;;  %v1585_v38 = vpop.f32.mrb[75].mxu1  ;;  %v1727_v39 = vmax.f32 %v1325_v29, 0.0  ;;  %v1791_v40 = vmax.f32 %v1581_v30, 0.0 }
 0x204   : > { %v1728_v41 = vmax.f32 %v1328_v35, 0.0  ;;  %v1792_v42 = vmax.f32 %v1584_v36, 0.0 }
 0x206   : > { %v3097_v43 = vpack.c.bf16 %v1728_v41, %v1727_v39  ;;  %v3257_v44 = vpack.c.bf16 %v1792_v42, %v1791_v40 }
 0x207   : > { %v1332_v45 = vpop.f32.mrb[76].mxu0  ;;  %v1588_v46 = vpop.f32.mrb[76].mxu1 }
 0x208   : > { %3341 = vst [vmem:[%s4206_s9 + $0x90] sm:$0xff] %v3097_v43   ;;  %3373 = vst [vmem:[%s4206_s9 + $0x190] sm:$0xff] %v3257_v44   ;;  %v1333_v47 = vadd.f32 %v4195_v63, %v1332_v45  ;;  %v1589_v48 = vadd.f32 %v4195_v63, %v1588_v46  ;;  %v1334_v49 = vpop.f32.mrb[77].mxu0  ;;  %v1590_v50 = vpop.f32.mrb[77].mxu1 }
 0x209   : > { %v1335_v51 = vpop.f32.mrb[78].mxu0  ;;  %v1591_v52 = vpop.f32.mrb[78].mxu1 }
 0x20a   : > { %v1336_v53 = vadd.f32 %v4195_v63, %v1335_v51  ;;  %v1592_v54 = vadd.f32 %v4195_v63, %v1591_v52  ;;  %v1337_v55 = vpop.f32.mrb[79].mxu0  ;;  %v1593_v56 = vpop.f32.mrb[79].mxu1  ;;  %v1729_v57 = vmax.f32 %v1333_v47, 0.0  ;;  %v1793_v58 = vmax.f32 %v1589_v48, 0.0 }
 0x20c   : > { %v1730_v59 = vmax.f32 %v1336_v53, 0.0  ;;  %v1794_v60 = vmax.f32 %v1592_v54, 0.0 }
 0x20e   : > { %v3102_v61 = vpack.c.bf16 %v1730_v59, %v1729_v57  ;;  %v3262_v62 = vpack.c.bf16 %v1794_v60, %v1793_v58 }
 0x20f   : > { %v1340_v0 = vpop.f32.mrb[80].mxu0  ;;  %v1596_v1 = vpop.f32.mrb[80].mxu1 }
 0x210   : > { %3342 = vst [vmem:[%s4206_s9 + $0x98] sm:$0xff] %v3102_v61   ;;  %3374 = vst [vmem:[%s4206_s9 + $0x198] sm:$0xff] %v3262_v62   ;;  %v1341_v2 = vadd.f32 %v4195_v63, %v1340_v0  ;;  %v1597_v3 = vadd.f32 %v4195_v63, %v1596_v1  ;;  %v1342_v4 = vpop.f32.mrb[81].mxu0  ;;  %v1598_v5 = vpop.f32.mrb[81].mxu1 }
 0x211   : > { %v1343_v6 = vpop.f32.mrb[82].mxu0  ;;  %v1599_v7 = vpop.f32.mrb[82].mxu1 }
 0x212   : > { %v1344_v8 = vadd.f32 %v4195_v63, %v1343_v6  ;;  %v1600_v9 = vadd.f32 %v4195_v63, %v1599_v7  ;;  %v1345_v10 = vpop.f32.mrb[83].mxu0  ;;  %v1601_v11 = vpop.f32.mrb[83].mxu1  ;;  %v1731_v12 = vmax.f32 %v1341_v2, 0.0  ;;  %v1795_v13 = vmax.f32 %v1597_v3, 0.0 }
 0x213   : > { %v4365_v11 = vld [vmem:[%s4473_s2] ss:$0 sm:$0xff] }
 0x214   : > { %v1732_v14 = vmax.f32 %v1344_v8, 0.0  ;;  %v1796_v15 = vmax.f32 %v1600_v9, 0.0 }
 0x216   : > { %v3107_v16 = vpack.c.bf16 %v1732_v14, %v1731_v12  ;;  %v3267_v17 = vpack.c.bf16 %v1796_v15, %v1795_v13 }
 0x217   : > { %v1348_v18 = vpop.f32.mrb[84].mxu0  ;;  %v1604_v19 = vpop.f32.mrb[84].mxu1 }
 0x218   : > { %3343 = vst [vmem:[%s4206_s9 + $0xa0] sm:$0xff] %v3107_v16   ;;  %3375 = vst [vmem:[%s4206_s9 + $0x1a0] sm:$0xff] %v3267_v17   ;;  %v1349_v20 = vadd.f32 %v4195_v63, %v1348_v18  ;;  %v1605_v21 = vadd.f32 %v4195_v63, %v1604_v19  ;;  %v1350_v22 = vpop.f32.mrb[85].mxu0  ;;  %v1606_v23 = vpop.f32.mrb[85].mxu1 }
 0x219   : > { %v1351_v24 = vpop.f32.mrb[86].mxu0  ;;  %v1607_v25 = vpop.f32.mrb[86].mxu1 }
 0x21a   : > { %v1352_v26 = vadd.f32 %v4195_v63, %v1351_v24  ;;  %v1608_v27 = vadd.f32 %v4195_v63, %v1607_v25  ;;  %v1353_v28 = vpop.f32.mrb[87].mxu0  ;;  %v1609_v29 = vpop.f32.mrb[87].mxu1  ;;  %v1733_v30 = vmax.f32 %v1349_v20, 0.0  ;;  %v1797_v31 = vmax.f32 %v1605_v21, 0.0 }
 0x21c   : > { %v1734_v32 = vmax.f32 %v1352_v26, 0.0  ;;  %v1798_v33 = vmax.f32 %v1608_v27, 0.0 }
 0x21e   : > { %v3112_v34 = vpack.c.bf16 %v1734_v32, %v1733_v30  ;;  %v3272_v35 = vpack.c.bf16 %v1798_v33, %v1797_v31 }
 0x21f   : > { %v1356_v36 = vpop.f32.mrb[88].mxu0  ;;  %v1612_v37 = vpop.f32.mrb[88].mxu1 }
 0x220   : > { %3344 = vst [vmem:[%s4206_s9 + $0xa8] sm:$0xff] %v3112_v34   ;;  %3376 = vst [vmem:[%s4206_s9 + $0x1a8] sm:$0xff] %v3272_v35   ;;  %v1357_v38 = vadd.f32 %v4195_v63, %v1356_v36  ;;  %v1613_v39 = vadd.f32 %v4195_v63, %v1612_v37  ;;  %v1358_v40 = vpop.f32.mrb[89].mxu0  ;;  %v1614_v41 = vpop.f32.mrb[89].mxu1 }
 0x221   : > { %v1359_v42 = vpop.f32.mrb[90].mxu0  ;;  %v1615_v43 = vpop.f32.mrb[90].mxu1 }
 0x222   : > { %v1360_v44 = vadd.f32 %v4195_v63, %v1359_v42  ;;  %v1616_v45 = vadd.f32 %v4195_v63, %v1615_v43  ;;  %v1361_v46 = vpop.f32.mrb[91].mxu0  ;;  %v1617_v47 = vpop.f32.mrb[91].mxu1  ;;  %v1735_v48 = vmax.f32 %v1357_v38, 0.0  ;;  %v1799_v49 = vmax.f32 %v1613_v39, 0.0 }
 0x224   : > { %v1736_v50 = vmax.f32 %v1360_v44, 0.0  ;;  %v1800_v51 = vmax.f32 %v1616_v45, 0.0 }
 0x226   : > { %v3117_v52 = vpack.c.bf16 %v1736_v50, %v1735_v48  ;;  %v3277_v53 = vpack.c.bf16 %v1800_v51, %v1799_v49 }
 0x227   : > { %v1364_v54 = vpop.f32.mrb[92].mxu0  ;;  %v1620_v55 = vpop.f32.mrb[92].mxu1 }
 0x228   : > { %3345 = vst [vmem:[%s4206_s9 + $0xb0] sm:$0xff] %v3117_v52   ;;  %3377 = vst [vmem:[%s4206_s9 + $0x1b0] sm:$0xff] %v3277_v53   ;;  %v1365_v56 = vadd.f32 %v4195_v63, %v1364_v54  ;;  %v1621_v57 = vadd.f32 %v4195_v63, %v1620_v55  ;;  %v1366_v58 = vpop.f32.mrb[93].mxu0  ;;  %v1622_v59 = vpop.f32.mrb[93].mxu1 }
 0x229   : > { %v1367_v60 = vpop.f32.mrb[94].mxu0  ;;  %v1623_v61 = vpop.f32.mrb[94].mxu1 }
 0x22a   : > { %v1368_v62 = vadd.f32 %v4195_v63, %v1367_v60  ;;  %v1624_v0 = vadd.f32 %v4195_v63, %v1623_v61  ;;  %v1369_v1 = vpop.f32.mrb[95].mxu0  ;;  %v1625_v2 = vpop.f32.mrb[95].mxu1  ;;  %v1737_v3 = vmax.f32 %v1365_v56, 0.0  ;;  %v1801_v4 = vmax.f32 %v1621_v57, 0.0 }
 0x22c   : > { %v1738_v5 = vmax.f32 %v1368_v62, 0.0  ;;  %v1802_v6 = vmax.f32 %v1624_v0, 0.0 }
 0x22e   : > { %v3122_v7 = vpack.c.bf16 %v1738_v5, %v1737_v3  ;;  %v3282_v8 = vpack.c.bf16 %v1802_v6, %v1801_v4 }
 0x22f   : > { %v1372_v9 = vpop.f32.mrb[96].mxu0  ;;  %v1628_v10 = vpop.f32.mrb[96].mxu1 }
 0x230   : > { %3346 = vst [vmem:[%s4206_s9 + $0xb8] sm:$0xff] %v3122_v7   ;;  %3378 = vst [vmem:[%s4206_s9 + $0x1b8] sm:$0xff] %v3282_v8   ;;  %v1373_v12 = vadd.f32 %v4365_v11, %v1372_v9  ;;  %v1629_v63 = vadd.f32 %v4365_v11, %v1628_v10  ;;  %v1374_v13 = vpop.f32.mrb[97].mxu0  ;;  %v1630_v14 = vpop.f32.mrb[97].mxu1 }
 0x231   : > { %v1375_v15 = vpop.f32.mrb[98].mxu0  ;;  %v1631_v16 = vpop.f32.mrb[98].mxu1 }
 0x232   : > { %v1376_v17 = vadd.f32 %v4365_v11, %v1375_v15  ;;  %v1632_v18 = vadd.f32 %v4365_v11, %v1631_v16  ;;  %v1377_v19 = vpop.f32.mrb[99].mxu0  ;;  %v1633_v20 = vpop.f32.mrb[99].mxu1  ;;  %v1739_v21 = vmax.f32 %v1373_v12, 0.0  ;;  %v1803_v22 = vmax.f32 %v1629_v63, 0.0 }
 0x234   : > { %v1740_v23 = vmax.f32 %v1376_v17, 0.0  ;;  %v1804_v24 = vmax.f32 %v1632_v18, 0.0 }
 0x236   : > { %v3127_v25 = vpack.c.bf16 %v1740_v23, %v1739_v21  ;;  %v3287_v26 = vpack.c.bf16 %v1804_v24, %v1803_v22 }
 0x237   : > { %v1380_v27 = vpop.f32.mrb[100].mxu0  ;;  %v1636_v28 = vpop.f32.mrb[100].mxu1 }
 0x238   : > { %3347 = vst [vmem:[%s4206_s9 + $0xc0] sm:$0xff] %v3127_v25   ;;  %3379 = vst [vmem:[%s4206_s9 + $0x1c0] sm:$0xff] %v3287_v26   ;;  %v1381_v29 = vadd.f32 %v4365_v11, %v1380_v27  ;;  %v1637_v30 = vadd.f32 %v4365_v11, %v1636_v28  ;;  %v1382_v31 = vpop.f32.mrb[101].mxu0  ;;  %v1638_v32 = vpop.f32.mrb[101].mxu1 }
 0x239   : > { %v1383_v33 = vpop.f32.mrb[102].mxu0  ;;  %v1639_v34 = vpop.f32.mrb[102].mxu1 }
 0x23a   : > { %v1384_v35 = vadd.f32 %v4365_v11, %v1383_v33  ;;  %v1640_v36 = vadd.f32 %v4365_v11, %v1639_v34  ;;  %v1385_v37 = vpop.f32.mrb[103].mxu0  ;;  %v1641_v38 = vpop.f32.mrb[103].mxu1  ;;  %v1741_v39 = vmax.f32 %v1381_v29, 0.0  ;;  %v1805_v40 = vmax.f32 %v1637_v30, 0.0 }
 0x23c   : > { %v1742_v41 = vmax.f32 %v1384_v35, 0.0  ;;  %v1806_v42 = vmax.f32 %v1640_v36, 0.0 }
 0x23e   : > { %v3132_v43 = vpack.c.bf16 %v1742_v41, %v1741_v39  ;;  %v3292_v44 = vpack.c.bf16 %v1806_v42, %v1805_v40 }
 0x23f   : > { %v1388_v45 = vpop.f32.mrb[104].mxu0  ;;  %v1644_v46 = vpop.f32.mrb[104].mxu1 }
 0x240   : > { %3348 = vst [vmem:[%s4206_s9 + $0xc8] sm:$0xff] %v3132_v43   ;;  %3380 = vst [vmem:[%s4206_s9 + $0x1c8] sm:$0xff] %v3292_v44   ;;  %v1389_v47 = vadd.f32 %v4365_v11, %v1388_v45  ;;  %v1645_v48 = vadd.f32 %v4365_v11, %v1644_v46  ;;  %v1390_v49 = vpop.f32.mrb[105].mxu0  ;;  %v1646_v50 = vpop.f32.mrb[105].mxu1 }
 0x241   : > { %v1391_v51 = vpop.f32.mrb[106].mxu0  ;;  %v1647_v52 = vpop.f32.mrb[106].mxu1 }
 0x242   : > { %v1392_v53 = vadd.f32 %v4365_v11, %v1391_v51  ;;  %v1648_v54 = vadd.f32 %v4365_v11, %v1647_v52  ;;  %v1393_v55 = vpop.f32.mrb[107].mxu0  ;;  %v1649_v56 = vpop.f32.mrb[107].mxu1  ;;  %v1743_v57 = vmax.f32 %v1389_v47, 0.0  ;;  %v1807_v58 = vmax.f32 %v1645_v48, 0.0 }
 0x244   : > { %v1744_v59 = vmax.f32 %v1392_v53, 0.0  ;;  %v1808_v60 = vmax.f32 %v1648_v54, 0.0 }
 0x246   : > { %v3137_v61 = vpack.c.bf16 %v1744_v59, %v1743_v57  ;;  %v3297_v62 = vpack.c.bf16 %v1808_v60, %v1807_v58 }
 0x247   : > { %v1396_v0 = vpop.f32.mrb[108].mxu0  ;;  %v1652_v1 = vpop.f32.mrb[108].mxu1 }
 0x248   : > { %3349 = vst [vmem:[%s4206_s9 + $0xd0] sm:$0xff] %v3137_v61   ;;  %3381 = vst [vmem:[%s4206_s9 + $0x1d0] sm:$0xff] %v3297_v62   ;;  %v1397_v2 = vadd.f32 %v4365_v11, %v1396_v0  ;;  %v1653_v3 = vadd.f32 %v4365_v11, %v1652_v1  ;;  %v1398_v4 = vpop.f32.mrb[109].mxu0  ;;  %v1654_v5 = vpop.f32.mrb[109].mxu1 }
 0x249   : > { %v1399_v6 = vpop.f32.mrb[110].mxu0  ;;  %v1655_v7 = vpop.f32.mrb[110].mxu1 }
 0x24a   : > { %v1400_v8 = vadd.f32 %v4365_v11, %v1399_v6  ;;  %v1656_v9 = vadd.f32 %v4365_v11, %v1655_v7  ;;  %v1401_v10 = vpop.f32.mrb[111].mxu0  ;;  %v1657_v12 = vpop.f32.mrb[111].mxu1  ;;  %v1745_v63 = vmax.f32 %v1397_v2, 0.0  ;;  %v1809_v13 = vmax.f32 %v1653_v3, 0.0 }
 0x24c   : > { %v1746_v14 = vmax.f32 %v1400_v8, 0.0  ;;  %v1810_v15 = vmax.f32 %v1656_v9, 0.0 }
 0x24e   : > { %v3142_v16 = vpack.c.bf16 %v1746_v14, %v1745_v63  ;;  %v3302_v17 = vpack.c.bf16 %v1810_v15, %v1809_v13 }
 0x24f   : > { %v1404_v18 = vpop.f32.mrb[112].mxu0  ;;  %v1660_v19 = vpop.f32.mrb[112].mxu1 }
 0x250   : > { %3350 = vst [vmem:[%s4206_s9 + $0xd8] sm:$0xff] %v3142_v16   ;;  %3382 = vst [vmem:[%s4206_s9 + $0x1d8] sm:$0xff] %v3302_v17   ;;  %v1405_v20 = vadd.f32 %v4365_v11, %v1404_v18  ;;  %v1661_v21 = vadd.f32 %v4365_v11, %v1660_v19  ;;  %v1406_v22 = vpop.f32.mrb[113].mxu0  ;;  %v1662_v23 = vpop.f32.mrb[113].mxu1 }
 0x251   : > { %v1407_v24 = vpop.f32.mrb[114].mxu0  ;;  %v1663_v25 = vpop.f32.mrb[114].mxu1 }
 0x252   : > { %v1408_v26 = vadd.f32 %v4365_v11, %v1407_v24  ;;  %v1664_v27 = vadd.f32 %v4365_v11, %v1663_v25  ;;  %v1409_v28 = vpop.f32.mrb[115].mxu0  ;;  %v1665_v29 = vpop.f32.mrb[115].mxu1  ;;  %v1747_v30 = vmax.f32 %v1405_v20, 0.0  ;;  %v1811_v31 = vmax.f32 %v1661_v21, 0.0 }
 0x254   : > { %v1748_v32 = vmax.f32 %v1408_v26, 0.0  ;;  %v1812_v33 = vmax.f32 %v1664_v27, 0.0 }
 0x256   : > { %v3147_v34 = vpack.c.bf16 %v1748_v32, %v1747_v30  ;;  %v3307_v35 = vpack.c.bf16 %v1812_v33, %v1811_v31 }
 0x257   : > { %v1412_v36 = vpop.f32.mrb[116].mxu0  ;;  %v1668_v37 = vpop.f32.mrb[116].mxu1 }
 0x258   : > { %3351 = vst [vmem:[%s4206_s9 + $0xe0] sm:$0xff] %v3147_v34   ;;  %3383 = vst [vmem:[%s4206_s9 + $0x1e0] sm:$0xff] %v3307_v35   ;;  %v1413_v38 = vadd.f32 %v4365_v11, %v1412_v36  ;;  %v1669_v39 = vadd.f32 %v4365_v11, %v1668_v37  ;;  %v1414_v40 = vpop.f32.mrb[117].mxu0  ;;  %v1670_v41 = vpop.f32.mrb[117].mxu1 }
 0x259   : > { %v1415_v42 = vpop.f32.mrb[118].mxu0  ;;  %v1671_v43 = vpop.f32.mrb[118].mxu1 }
 0x25a   : > { %v1416_v44 = vadd.f32 %v4365_v11, %v1415_v42  ;;  %v1672_v45 = vadd.f32 %v4365_v11, %v1671_v43  ;;  %v1417_v46 = vpop.f32.mrb[119].mxu0  ;;  %v1673_v47 = vpop.f32.mrb[119].mxu1  ;;  %v1749_v48 = vmax.f32 %v1413_v38, 0.0  ;;  %v1813_v49 = vmax.f32 %v1669_v39, 0.0 }
 0x25c   : > { %v1750_v50 = vmax.f32 %v1416_v44, 0.0  ;;  %v1814_v51 = vmax.f32 %v1672_v45, 0.0 }
 0x25e   : > { %v3152_v52 = vpack.c.bf16 %v1750_v50, %v1749_v48  ;;  %v3312_v53 = vpack.c.bf16 %v1814_v51, %v1813_v49 }
 0x25f   : > { %v1420_v54 = vpop.f32.mrb[120].mxu0  ;;  %v1676_v55 = vpop.f32.mrb[120].mxu1 }
 0x260   : > { %3352 = vst [vmem:[%s4206_s9 + $0xe8] sm:$0xff] %v3152_v52   ;;  %3384 = vst [vmem:[%s4206_s9 + $0x1e8] sm:$0xff] %v3312_v53   ;;  %v1421_v56 = vadd.f32 %v4365_v11, %v1420_v54  ;;  %v1677_v57 = vadd.f32 %v4365_v11, %v1676_v55  ;;  %v1422_v58 = vpop.f32.mrb[121].mxu0  ;;  %v1678_v59 = vpop.f32.mrb[121].mxu1 }
 0x261   : > { %v1423_v60 = vpop.f32.mrb[122].mxu0  ;;  %v1679_v61 = vpop.f32.mrb[122].mxu1 }
 0x262   : > { %v1424_v62 = vadd.f32 %v4365_v11, %v1423_v60  ;;  %v1680_v0 = vadd.f32 %v4365_v11, %v1679_v61  ;;  %v1425_v1 = vpop.f32.mrb[123].mxu0  ;;  %v1681_v2 = vpop.f32.mrb[123].mxu1  ;;  %v1751_v3 = vmax.f32 %v1421_v56, 0.0  ;;  %v1815_v4 = vmax.f32 %v1677_v57, 0.0 }
 0x264   : > { %v1752_v5 = vmax.f32 %v1424_v62, 0.0  ;;  %v1816_v6 = vmax.f32 %v1680_v0, 0.0 }
 0x266   : > { %v3157_v7 = vpack.c.bf16 %v1752_v5, %v1751_v3  ;;  %v3317_v8 = vpack.c.bf16 %v1816_v6, %v1815_v4 }
 0x267   : > { %v1428_v9 = vpop.f32.mrb[124].mxu0  ;;  %v1684_v10 = vpop.f32.mrb[124].mxu1 }
 0x268   : > { %3353 = vst [vmem:[%s4206_s9 + $0xf0] sm:$0xff] %v3157_v7   ;;  %3385 = vst [vmem:[%s4206_s9 + $0x1f0] sm:$0xff] %v3317_v8   ;;  %v1429_v12 = vadd.f32 %v4365_v11, %v1428_v9  ;;  %v1685_v63 = vadd.f32 %v4365_v11, %v1684_v10  ;;  %v1430_v13 = vpop.f32.mrb[125].mxu0  ;;  %v1686_v14 = vpop.f32.mrb[125].mxu1 }
 0x269   : > { %v1431_v15 = vpop.f32.mrb[126].mxu0  ;;  %v1687_v16 = vpop.f32.mrb[126].mxu1 }
 0x26a   : > { %v1432_v17 = vadd.f32 %v4365_v11, %v1431_v15  ;;  %v1688_v18 = vadd.f32 %v4365_v11, %v1687_v16  ;;  %v1433_v19 = vpop.f32.mrb[127].mxu0  ;;  %v1689_v20 = vpop.f32.mrb[127].mxu1  ;;  %v1753_v21 = vmax.f32 %v1429_v12, 0.0  ;;  %v1817_v22 = vmax.f32 %v1685_v63, 0.0 }
 0x26c   : > { %v1754_v23 = vmax.f32 %v1432_v17, 0.0  ;;  %v1818_v24 = vmax.f32 %v1688_v18, 0.0 }
 0x26e   : > { %v3162_v11 = vpack.c.bf16 %v1754_v23, %v1753_v21  ;;  %v3322_v25 = vpack.c.bf16 %v1818_v24, %v1817_v22 }
 0x270   : > { %3354 = vst [vmem:[%s4206_s9 + $0xf8] sm:$0xff] %v3162_v11   ;;  %3386 = vst [vmem:[%s4206_s9 + $0x1f8] sm:$0xff] %v3322_v25  }
 0x271   : > { %3779 = shalt.err (!%p3776_p5)
}
 0x272   : > { %s3780_s6 = scalar_lea.hbm %s4418_s21, 8192  ;;  %s3784_s24 = scalar_lea.hbm %s4474_s3, 16384 }
 0x273   : > { %p3781_p9 = scmp.ne.s32.totalorder %s4418_s21, %s3780_s6  ;;  %p3785_p3 = scmp.lt.u32.totalorder %s4418_s21, %s4474_s3 }
 0x274   : > { %p3786_p7 = scmp.lt.u32.totalorder %s3784_s24, %s3780_s6  ;;  %p3788_p4 = scmp.lt.u32.totalorder %s3780_s6, %s4418_s21 }
 0x275   : > { %p3782_p1 = pnand %p3781_p9, %p3980_p10 }
 0x276   : > { %p3787_p13 = por %p3786_p7, %p3785_p3 }
 0x277   : > { %p3783_p2 = pneg %p3782_p1 }
 0x278   : > { %p3789_p6 = por %p3788_p4, %p3787_p13 }
 0x27a   : > { %p3790_p8 = pnand %p3789_p6, %p3783_p2 }
 0x27c   : > { %3793 = shalt.err (!%p3790_p8)
}
 0x27d   : > { %s3862_s11 = smov 64   ;;  %s3863_s18 = smov 4  }
 0x27e   : > { %3425 = dma.vmem_to_hbm [thread:$0]  (%p3980_p10), %s4420_s26, 8192, %s4418_s21, %s2460_s15, %s3862_s11, %s3862_s11, %s3863_s18  }
 0x27f PF: > { %s2489_s7 = sand.u32 1, %s3832_s12   ;;  %p4492_p12 = scmp.ne.s32.totalorder %s4482_s23, 0 }
 0x280   : > { %p4493_p11 = scmp.ge.s32.totalorder %s3852_s17, 2  ;;  %s2490_s8 = scalar_lea.sflag [#allocation4], %s2489_s7 }
 0x282   : > { %p3436_p0 = pnand %p4493_p11, %p4492_p12 }
 0x284   : > { %3827 = dma.done.wait (!%p3436_p0), %s2490_s8, 8192  }
 0x285   : > { %3829 = vsyncadd (!%p3436_p0), %s2490_s8, 4294959104  ;;  %s20_s17 = sadd.s32 1, %s3852_s17   ;;  %s4494_s12 = smov %s3836_s13 }
 0x286   : > { %p17_p5 = scmp.ge.s32.totalorder %s20_s17, 4   ;;  %s4495_s13 = smov %s3840_s14 }
 0x287   : > { %s4496_s14 = smov %s3989_s5  ;;  %s4497_s15 = smov %s3848_s16 }
 0x288   : > { %s4498_s16 = smov %s4500_s28  ;;  %19 = sbr.rel (!%p17_p5) target bundleno = 7 (0x7), region = 85 }
 0x28f   :  { %2495 = vsyncpa [#allocation3], 1 }
 0x290   :  { %2497 = vsyncpa [#allocation3 + $0x1], 1 }
 0x291   :  { %2498 = vsyncpa [#allocation6], 1 }
 0x292   :  { %2499 = vsyncpa [#allocation4], 1 }
 0x293   :  { %2501 = vsyncpa [#allocation4 + $0x1], 1 }

</bundles_post_ra>
